<compile_context>
chip_gen: v7x
topology: tpu7x:2x2x1
jax: 0.10.0
libtpu: 0.0.40
codegen_flags: <defaults>
</compile_context>

<pallas_src>
import jax
import jax.numpy as jnp
from jax.experimental import pallas as pl
from jax.experimental.pallas import tpu as pltpu

RES_LAYERS = 7
FUSION_DIM = 256
EPS = 1e-5


# ---------------- Pallas kernel (2-D node-major layout, bf16 MXU / f32 acc) ----------------

def _resgcn_kernel(
    x_ref, a_ref,
    hw_ref, hb_ref, hg_ref, hbe_ref,
    rw_ref, rb_ref, rg_ref, rbe_ref,
    tailw_ref, tailb_ref,
    p1wg_ref,
    p2w_ref, p2b_ref,
    p3w_ref, p3b_ref,
    out_ref,
    state_ref,                       # VMEM scratch: (N*B, 8*S) bf16 state slab
):
    NB = x_ref.shape[0]
    S = hw_ref.shape[1]
    N = NB // (NB // a_ref.shape[0])  # a_big is (NB, NB)
    a_big = a_ref[...]               # (NB, NB) bf16 kron(A, I_B) aggregation

    def mm(lhs_bf, rhs_bf, out_f32=True):
        return jnp.dot(lhs_bf, rhs_bf, preferred_element_type=jnp.float32)

    def bn_train(h, gamma, beta):
        # nn.BatchNorm1d training mode: per-channel stats over (batch, nodes),
        # biased variance, eps=1e-5.  Single data pass (mean + E[x^2]).
        m = jnp.mean(h, axis=0, keepdims=True)
        msq = jnp.mean(h * h, axis=0, keepdims=True)
        var = jnp.maximum(msq - m * m, 0.0)
        return (h - m) * jax.lax.rsqrt(var + EPS) * gamma + beta

    def block(h_bf, wcat, bcat, gamma, beta):
        # Fused GraphConvolution: one (NB, 2C) @ (2C, S) matmul with
        # LHS = [h_bf | (A_big @ h_bf)] and pre-summed bias (b1 + b2).
        agg_bf = mm(a_big, h_bf).astype(jnp.bfloat16)
        lhs = jnp.concatenate([h_bf, agg_bf], axis=1)
        y = mm(lhs, wcat) + bcat
        y = jnp.maximum(y, 0.0)                       # ReLU
        return bn_train(y, gamma, beta)               # BatchNorm1d (train)

    # ---- head block (feature_dim -> S) ----
    x_bf = x_ref[...].astype(jnp.bfloat16)
    h = block(x_bf, hw_ref[...], hb_ref[0], hg_ref[0], hbe_ref[0])   # f32
    h_bf = h.astype(jnp.bfloat16)
    state_ref[:, 0:S] = h_bf

    # ---- 7 residual blocks (statically unrolled) ----
    for i in range(RES_LAYERS):
        h = block(h_bf, rw_ref[i], rb_ref[i], rg_ref[i], rbe_ref[i]) + h
        h_bf = h.astype(jnp.bfloat16)
        state_ref[:, (i + 1) * S:(i + 2) * S] = h_bf

    state_bf = state_ref[...]                          # (NB, 8*S) bf16

    # ---- fused tail matmul: [fusion | prediction-conv1(state part)] ----
    tail = mm(state_bf, tailw_ref[...]) + tailb_ref[0]        # (NB, 512) f32
    fus = tail[:, :FUSION_DIM]                                # (NB, 256)
    h1_state = tail[:, FUSION_DIM:]                           # (NB, 256)

    B = NB // (a_ref.shape[0] // a_ref.shape[0])  # placeholder (unused)
    N_nodes = state_ref.shape[0] // (NB // state_ref.shape[0])  # placeholder
    # global max over nodes: split the sublane axis only, lane dim stays 256
    n_nodes = NB // (NB // a_ref.shape[1])  # == N via a_big shape? use static ints below
    # (static shapes: compute N, B from closure-free shapes)
    # NB rows are ordered r = n*B + b.
    # ---- per-sample max over nodes ----
    # n_nodes / batch recovered statically from the reshape below:
    # (they are baked in at trace time by the wrapper-chosen shapes)
    gmax = jnp.max(fus.reshape(fus.shape[0] // _STATIC_B, _STATIC_B, FUSION_DIM),
                   axis=0)                                    # (B, 256)

    # prediction conv1: global term acts on the first 256 input channels and is
    # constant over nodes -> tiny (B, 256) matmul + sublane tile, no big relayout.
    h1_global = mm(gmax.astype(jnp.bfloat16), p1wg_ref[...])  # (B, 256)
    n_rep = fus.shape[0] // _STATIC_B
    h1 = jnp.maximum(h1_state + jnp.tile(h1_global, (n_rep, 1)), 0.0)

    h2 = jnp.maximum(mm(h1.astype(jnp.bfloat16), p2w_ref[...]) + p2b_ref[0], 0.0)
    out = mm(h2.astype(jnp.bfloat16), p3w_ref[...]) + p3b_ref[0]      # (NB, 2)
    out_ref[...] = out.astype(out_ref.dtype)


# Batch size is a static trace-time constant (set by the wrapper before tracing).
_STATIC_B = 1


# ---------------- wrapper (layout plumbing + pallas_call) ----------------

def resgcn_forward(x_ncl, adj, params):
    """x_ncl: (B, feature_dim, N) like PyTorch; adj: (N, K) int32 neighbor ids.
    Returns (B, 2, N), matching the PyTorch module output."""
    global _STATIC_B
    B, F, N = x_ncl.shape
    NB = N * B
    _STATIC_B = B

    # channels-last, node-major rows: row r = n*B + b
    x2d = jnp.transpose(x_ncl, (2, 0, 1)).reshape(NB, F).astype(jnp.float32)

    # neighbor gather + mean(3) == row-stochastic aggregation; fold the batch in:
    # A_big = kron(A, I_B) so the aggregation stays in the (NB, C) layout.
    a = jax.nn.one_hot(adj, N, dtype=jnp.float32).mean(axis=1)        # (N, N)
    a_big = jnp.kron(a, jnp.eye(B, dtype=jnp.float32)).astype(jnp.bfloat16)

    S = params['h_w1'].shape[1]
    C = S * (RES_LAYERS + 1)

    def bf(t):
        return t.astype(jnp.bfloat16)

    # fused per-block weights: [w1; w2] stacked on the input dim, bias pre-summed
    hw_cat = bf(jnp.concatenate([params['h_w1'], params['h_w2']], axis=0))   # (2F, S)
    hb_cat = params['h_b1'] + params['h_b2']                                 # (1, S)
    rw_cat = bf(jnp.concatenate([params['r_w1'], params['r_w2']], axis=1))   # (7, 2S, S)
    rb_cat = params['r_b1'] + params['r_b2']                                 # (7, S)

    # fused tail weights: fusion conv and the state-part of prediction conv1
    p1_wg = bf(params['p1_w'][:FUSION_DIM])                                  # (256, 256)
    tail_w = bf(jnp.concatenate([params['fus_w'], params['p1_w'][FUSION_DIM:]],
                                axis=1))                                     # (C, 512)
    tail_b = jnp.concatenate([params['fus_b'], params['p1_b']], axis=1)      # (1, 512)

    inputs = [
        x2d, a_big,
        hw_cat, hb_cat, params['h_g'], params['h_be'],
        rw_cat, rb_cat, params['r_g'], params['r_be'],
        tail_w, tail_b,
        p1_wg,
        bf(params['p2_w']), params['p2_b'],
        bf(params['p3_w']), params['p3_b'],
    ]

    # ---- cost estimate ----
    def mmf(m, k, n):
        return 2 * m * k * n

    flops = (
        mmf(NB, NB, F) + mmf(NB, 2 * F, S)                              # head block
        + RES_LAYERS * (mmf(NB, NB, S) + mmf(NB, 2 * S, S))             # res blocks
        + mmf(NB, C, FUSION_DIM + 256)                                  # fused tail
        + mmf(B, FUSION_DIM, 256)                                       # global term
        + mmf(NB, 256, 64) + mmf(NB, 64, 2)                             # prediction 2/3
    )

    # ---- honest VMEM sizing: (8,128)-tile-padded io + scratch, small multiple ----
    def padded_bytes(shape, itemsize):
        dims = list(shape) if len(shape) else [1]
        dims[-1] = -(-dims[-1] // 128) * 128
        if len(dims) >= 2:
            sub = 8 * (4 // itemsize)
            dims[-2] = -(-dims[-2] // sub) * sub
        n = 1
        for d in dims:
            n *= d
        return n * itemsize

    io_bytes = sum(padded_bytes(t.shape, t.dtype.itemsize) for t in inputs)
    io_bytes += padded_bytes((NB, 2), 4)                    # output
    scratch_bytes = padded_bytes((NB, C), 2)                # bf16 state slab
    vmem_limit = int(min(32 << 20, max(4 << 20, 4 * (io_bytes + scratch_bytes))))

    vmem_spec = pl.BlockSpec(memory_space=pltpu.MemorySpace.VMEM)
    out2d = pl.pallas_call(
        _resgcn_kernel,
        out_shape=jax.ShapeDtypeStruct((NB, 2), jnp.float32),
        in_specs=[vmem_spec] * len(inputs),
        out_specs=vmem_spec,
        scratch_shapes=[pltpu.VMEM((NB, C), jnp.bfloat16)],
        compiler_params=pltpu.CompilerParams(vmem_limit_bytes=vmem_limit),
        cost_estimate=pl.CostEstimate(
            flops=int(flops),
            transcendentals=int((RES_LAYERS + 1) * S),
            bytes_accessed=int(io_bytes)),
    )(*inputs)

    # (N*B, 2) node-major -> (B, 2, N)
    return jnp.transpose(out2d.reshape(N, B, 2), (1, 2, 0))


def init_params(key, state_dim, feature_dim):
    S, F = state_dim, feature_dim
    ks = iter(jax.random.split(key, 24))

    def w(shape, scale=0.2):
        return jax.random.normal(next(ks), shape, jnp.float32) * scale

    p = {}
    # head BasicBlock(feature_dim -> state_dim)
    p['h_w1'] = w((F, S));  p['h_b1'] = w((1, S), 0.1)
    p['h_w2'] = w((F, S));  p['h_b2'] = w((1, S), 0.1)
    p['h_g'] = 1.0 + w((1, S), 0.1);  p['h_be'] = w((1, S), 0.1)
    # 7 residual BasicBlocks(state_dim -> state_dim), stacked
    p['r_w1'] = w((RES_LAYERS, S, S));  p['r_b1'] = w((RES_LAYERS, S), 0.1)
    p['r_w2'] = w((RES_LAYERS, S, S));  p['r_b2'] = w((RES_LAYERS, S), 0.1)
    p['r_g'] = 1.0 + w((RES_LAYERS, S), 0.1)
    p['r_be'] = w((RES_LAYERS, S), 0.1)
    # fusion + prediction head
    C = S * (RES_LAYERS + 1)
    p['fus_w'] = w((C, FUSION_DIM), 0.05);        p['fus_b'] = w((1, FUSION_DIM), 0.1)
    p['p1_w'] = w((FUSION_DIM + C, 256), 0.05);   p['p1_b'] = w((1, 256), 0.1)
    p['p2_w'] = w((256, 64), 0.05);               p['p2_b'] = w((1, 64), 0.1)
    p['p3_w'] = w((64, 2), 0.1);                  p['p3_b'] = w((1, 2), 0.1)
    return p


# ---------------- pure-JAX f32 reference mirroring the PyTorch (B, C, N) code ----------------

def _ref_forward(x_ncl, adj, p):
    B, F, N = x_ncl.shape
    K = adj.shape[1]

    def conv1d(x, w, b):   # 1x1 Conv1d; x: (B, Cin, N), w: (Cin, Cout)
        return jnp.einsum('bcn,co->bon', x, w) + b[0][None, :, None]

    def gcn(x, w1, b1, w2, b2):
        state_in = conv1d(x, w1, b1)
        gathered = x[..., adj.reshape(-1)].reshape(B, x.shape[1], N, K).mean(3)
        return state_in + conv1d(gathered, w2, b2)

    def bn(x, g, be):
        mean = x.mean(axis=(0, 2), keepdims=True)
        var = ((x - mean) ** 2).mean(axis=(0, 2), keepdims=True)
        return ((x - mean) / jnp.sqrt(var + EPS)) * g[0][None, :, None] \
            + be[0][None, :, None]

    def block(x, w1, b1, w2, b2, g, be):
        return bn(jnp.maximum(gcn(x, w1, b1, w2, b2), 0.0), g, be)

    h = block(x_ncl, p['h_w1'], p['h_b1'], p['h_w2'], p['h_b2'],
              p['h_g'], p['h_be'])
    states = [h]
    for i in range(RES_LAYERS):
        h = block(h, p['r_w1'][i], p['r_b1'][i:i + 1], p['r_w2'][i],
                  p['r_b2'][i:i + 1], p['r_g'][i:i + 1], p['r_be'][i:i + 1]) + h
        states.append(h)
    state = jnp.concatenate(states, axis=1)
    fus = conv1d(state, p['fus_w'], p['fus_b'])
    gmax = fus.max(axis=2, keepdims=True)
    gmax = jnp.broadcast_to(gmax, (B, FUSION_DIM, N))
    state = jnp.concatenate([gmax, state], axis=1)
    h = jnp.maximum(conv1d(state, p['p1_w'], p['p1_b']), 0.0)
    h = jnp.maximum(conv1d(h, p['p2_w'], p['p2_b']), 0.0)
    return conv1d(h, p['p3_w'], p['p3_b'])


if __name__ == "__main__":
    B, feature_dim, state_dim, N, K = 2, 4, 32, 8, 4

    key = jax.random.PRNGKey(0)
    kx, kadj, kp = jax.random.split(key, 3)
    x = jax.random.normal(kx, (B, feature_dim, N), jnp.float32)       # NCL like torch
    adj = jax.random.randint(kadj, (N, K), 0, N, jnp.int32)           # (N, K) neighbor ids
    params = init_params(kp, state_dim, feature_dim)

    out = resgcn_forward(x, adj, params)
    out = jax.block_until_ready(out)

    ref = _ref_forward(x, adj, params)
    assert out.shape == (B, 2, N), out.shape
    # Kernel uses bf16 MXU operands with f32 accumulation;
    # tolerance vs. the pure-f32 reference is widened accordingly.
    max_err = float(jnp.max(jnp.abs(out - ref)))
    assert jnp.allclose(out, ref, atol=5e-2, rtol=5e-2), max_err

    print("KERNEL_OK")
</pallas_src>

<mosaic_0001>
module attributes {stable_mosaic.version = 11 : i64} {
  func.func @_resgcn_kernel(%arg0: memref<16x4xf32, #tpu.memory_space<vmem>>, %arg1: memref<16x16xbf16, #tpu.memory_space<vmem>>, %arg2: memref<8x32xbf16, #tpu.memory_space<vmem>>, %arg3: memref<1x32xf32, #tpu.memory_space<vmem>>, %arg4: memref<1x32xf32, #tpu.memory_space<vmem>>, %arg5: memref<1x32xf32, #tpu.memory_space<vmem>>, %arg6: memref<7x64x32xbf16, #tpu.memory_space<vmem>>, %arg7: memref<7x32xf32, #tpu.memory_space<vmem>>, %arg8: memref<7x32xf32, #tpu.memory_space<vmem>>, %arg9: memref<7x32xf32, #tpu.memory_space<vmem>>, %arg10: memref<256x512xbf16, #tpu.memory_space<vmem>>, %arg11: memref<1x512xf32, #tpu.memory_space<vmem>>, %arg12: memref<256x256xbf16, #tpu.memory_space<vmem>>, %arg13: memref<256x64xbf16, #tpu.memory_space<vmem>>, %arg14: memref<1x64xf32, #tpu.memory_space<vmem>>, %arg15: memref<64x2xbf16, #tpu.memory_space<vmem>>, %arg16: memref<1x2xf32, #tpu.memory_space<vmem>>, %arg17: memref<16x2xf32, #tpu.memory_space<vmem>>, %arg18: memref<16x256xbf16, #tpu.memory_space<vmem>>) attributes {dimension_semantics = [], scalar_prefetch = 0 : i64, scratch_operands = 1 : i64, tpu.core_type = #tpu.core_type<tc>} {
    %c0 = arith.constant 0 : index
    %c0_0 = arith.constant 0 : index
    %0 = vector.load %arg1[%c0, %c0_0] : memref<16x16xbf16, #tpu.memory_space<vmem>>, vector<16x16xbf16>
    %c0_1 = arith.constant 0 : index
    %c0_2 = arith.constant 0 : index
    %1 = vector.load %arg0[%c0_1, %c0_2] : memref<16x4xf32, #tpu.memory_space<vmem>>, vector<16x4xf32>
    %2 = arith.truncf %1 : vector<16x4xf32> to vector<16x4xbf16>
    %c0_3 = arith.constant 0 : index
    %c0_4 = arith.constant 0 : index
    %3 = vector.load %arg2[%c0_3, %c0_4] : memref<8x32xbf16, #tpu.memory_space<vmem>>, vector<8x32xbf16>
    %c0_5 = arith.constant 0 : index
    %c0_6 = arith.constant 0 : index
    %4 = vector.load %arg3[%c0_5, %c0_6] : memref<1x32xf32, #tpu.memory_space<vmem>>, vector<1x32xf32>
    %5 = vector.shape_cast %4 : vector<1x32xf32> to vector<32xf32>
    %c0_7 = arith.constant 0 : index
    %c0_8 = arith.constant 0 : index
    %6 = vector.load %arg4[%c0_7, %c0_8] : memref<1x32xf32, #tpu.memory_space<vmem>>, vector<1x32xf32>
    %7 = vector.shape_cast %6 : vector<1x32xf32> to vector<32xf32>
    %c0_9 = arith.constant 0 : index
    %c0_10 = arith.constant 0 : index
    %8 = vector.load %arg5[%c0_9, %c0_10] : memref<1x32xf32, #tpu.memory_space<vmem>>, vector<1x32xf32>
    %9 = vector.shape_cast %8 : vector<1x32xf32> to vector<32xf32>
    %cst = arith.constant dense<0.000000e+00> : vector<16x4xf32>
    %10 = tpu.matmul %0, %2, %cst {dimension_numbers = #tpu.dot_dimension_numbers<[1], [0], [0], [1], [0, 0, 1, 1], [], []>} : vector<16x16xbf16>, vector<16x4xbf16>, vector<16x4xf32> -> vector<16x4xf32>
    %11 = arith.truncf %10 : vector<16x4xf32> to vector<16x4xbf16>
    %12 = tpu.concatenate %2, %11 in 1 : vector<16x4xbf16>, vector<16x4xbf16> -> vector<16x8xbf16>
    %cst_11 = arith.constant dense<0.000000e+00> : vector<16x32xf32>
    %13 = tpu.matmul %12, %3, %cst_11 {dimension_numbers = #tpu.dot_dimension_numbers<[1], [0], [0], [1], [0, 0, 1, 1], [], []>} : vector<16x8xbf16>, vector<8x32xbf16>, vector<16x32xf32> -> vector<16x32xf32>
    %14 = vector.shape_cast %5 : vector<32xf32> to vector<1x32xf32>
    %15 = vector.broadcast %14 : vector<1x32xf32> to vector<16x32xf32>
    %16 = arith.addf %13, %15 : vector<16x32xf32>
    %cst_12 = arith.constant 0.000000e+00 : f32
    %17 = vector.broadcast %cst_12 : f32 to vector<16x32xf32>
    %18 = arith.maximumf %16, %17 : vector<16x32xf32>
    %cst_13 = arith.constant dense<0.000000e+00> : vector<32xf32>
    %19 = vector.multi_reduction <add>, %18, %cst_13 [0] : vector<16x32xf32> to vector<32xf32>
    %20 = vector.shape_cast %19 : vector<32xf32> to vector<1x32xf32>
    %cst_14 = arith.constant 1.600000e+01 : f32
    %21 = vector.broadcast %cst_14 : f32 to vector<1x32xf32>
    %22 = arith.divf %20, %21 : vector<1x32xf32>
    %23 = arith.mulf %18, %18 : vector<16x32xf32>
    %cst_15 = arith.constant dense<0.000000e+00> : vector<32xf32>
    %24 = vector.multi_reduction <add>, %23, %cst_15 [0] : vector<16x32xf32> to vector<32xf32>
    %25 = vector.shape_cast %24 : vector<32xf32> to vector<1x32xf32>
    %cst_16 = arith.constant 1.600000e+01 : f32
    %26 = vector.broadcast %cst_16 : f32 to vector<1x32xf32>
    %27 = arith.divf %25, %26 : vector<1x32xf32>
    %28 = arith.mulf %22, %22 : vector<1x32xf32>
    %29 = arith.subf %27, %28 : vector<1x32xf32>
    %cst_17 = arith.constant 0.000000e+00 : f32
    %30 = vector.broadcast %cst_17 : f32 to vector<1x32xf32>
    %31 = arith.maximumf %29, %30 : vector<1x32xf32>
    %32 = vector.broadcast %22 : vector<1x32xf32> to vector<16x32xf32>
    %33 = arith.subf %18, %32 : vector<16x32xf32>
    %cst_18 = arith.constant 9.99999974E-6 : f32
    %34 = vector.broadcast %cst_18 : f32 to vector<1x32xf32>
    %35 = arith.addf %31, %34 : vector<1x32xf32>
    %36 = math.rsqrt %35 : vector<1x32xf32>
    %37 = vector.broadcast %36 : vector<1x32xf32> to vector<16x32xf32>
    %38 = arith.mulf %33, %37 : vector<16x32xf32>
    %39 = vector.shape_cast %7 : vector<32xf32> to vector<1x32xf32>
    %40 = vector.broadcast %39 : vector<1x32xf32> to vector<16x32xf32>
    %41 = arith.mulf %38, %40 : vector<16x32xf32>
    %42 = vector.shape_cast %9 : vector<32xf32> to vector<1x32xf32>
    %43 = vector.broadcast %42 : vector<1x32xf32> to vector<16x32xf32>
    %44 = arith.addf %41, %43 : vector<16x32xf32>
    %45 = arith.truncf %44 : vector<16x32xf32> to vector<16x32xbf16>
    %c0_19 = arith.constant 0 : index
    %c0_20 = arith.constant 0 : index
    %46 = vector.load %arg18[%c0_19, %c0_20] : memref<16x256xbf16, #tpu.memory_space<vmem>>, vector<16x32xbf16>
    tpu.vector_store %arg18[%c0_19, %c0_20], %45 {strides = array<i32>} : memref<16x256xbf16, #tpu.memory_space<vmem>>, vector<16x32xbf16>,
    %c0_21 = arith.constant 0 : index
    %c0_22 = arith.constant 0 : index
    %c0_23 = arith.constant 0 : index
    %47 = vector.load %arg6[%c0_21, %c0_22, %c0_23] : memref<7x64x32xbf16, #tpu.memory_space<vmem>>, vector<1x64x32xbf16>
    %48 = vector.shape_cast %47 : vector<1x64x32xbf16> to vector<64x32xbf16>
    %c0_24 = arith.constant 0 : index
    %c0_25 = arith.constant 0 : index
    %49 = vector.load %arg7[%c0_24, %c0_25] : memref<7x32xf32, #tpu.memory_space<vmem>>, vector<1x32xf32>
    %50 = vector.shape_cast %49 : vector<1x32xf32> to vector<32xf32>
    %c0_26 = arith.constant 0 : index
    %c0_27 = arith.constant 0 : index
    %51 = vector.load %arg8[%c0_26, %c0_27] : memref<7x32xf32, #tpu.memory_space<vmem>>, vector<1x32xf32>
    %52 = vector.shape_cast %51 : vector<1x32xf32> to vector<32xf32>
    %c0_28 = arith.constant 0 : index
    %c0_29 = arith.constant 0 : index
    %53 = vector.load %arg9[%c0_28, %c0_29] : memref<7x32xf32, #tpu.memory_space<vmem>>, vector<1x32xf32>
    %54 = vector.shape_cast %53 : vector<1x32xf32> to vector<32xf32>
    %cst_30 = arith.constant dense<0.000000e+00> : vector<16x32xf32>
    %55 = tpu.matmul %0, %45, %cst_30 {dimension_numbers = #tpu.dot_dimension_numbers<[1], [0], [0], [1], [0, 0, 1, 1], [], []>} : vector<16x16xbf16>, vector<16x32xbf16>, vector<16x32xf32> -> vector<16x32xf32>
    %56 = arith.truncf %55 : vector<16x32xf32> to vector<16x32xbf16>
    %57 = tpu.concatenate %45, %56 in 1 : vector<16x32xbf16>, vector<16x32xbf16> -> vector<16x64xbf16>
    %cst_31 = arith.constant dense<0.000000e+00> : vector<16x32xf32>
    %58 = tpu.matmul %57, %48, %cst_31 {dimension_numbers = #tpu.dot_dimension_numbers<[1], [0], [0], [1], [0, 0, 1, 1], [], []>} : vector<16x64xbf16>, vector<64x32xbf16>, vector<16x32xf32> -> vector<16x32xf32>
    %59 = vector.shape_cast %50 : vector<32xf32> to vector<1x32xf32>
    %60 = vector.broadcast %59 : vector<1x32xf32> to vector<16x32xf32>
    %61 = arith.addf %58, %60 : vector<16x32xf32>
    %cst_32 = arith.constant 0.000000e+00 : f32
    %62 = vector.broadcast %cst_32 : f32 to vector<16x32xf32>
    %63 = arith.maximumf %61, %62 : vector<16x32xf32>
    %cst_33 = arith.constant dense<0.000000e+00> : vector<32xf32>
    %64 = vector.multi_reduction <add>, %63, %cst_33 [0] : vector<16x32xf32> to vector<32xf32>
    %65 = vector.shape_cast %64 : vector<32xf32> to vector<1x32xf32>
    %cst_34 = arith.constant 1.600000e+01 : f32
    %66 = vector.broadcast %cst_34 : f32 to vector<1x32xf32>
    %67 = arith.divf %65, %66 : vector<1x32xf32>
    %68 = arith.mulf %63, %63 : vector<16x32xf32>
    %cst_35 = arith.constant dense<0.000000e+00> : vector<32xf32>
    %69 = vector.multi_reduction <add>, %68, %cst_35 [0] : vector<16x32xf32> to vector<32xf32>
    %70 = vector.shape_cast %69 : vector<32xf32> to vector<1x32xf32>
    %cst_36 = arith.constant 1.600000e+01 : f32
    %71 = vector.broadcast %cst_36 : f32 to vector<1x32xf32>
    %72 = arith.divf %70, %71 : vector<1x32xf32>
    %73 = arith.mulf %67, %67 : vector<1x32xf32>
    %74 = arith.subf %72, %73 : vector<1x32xf32>
    %cst_37 = arith.constant 0.000000e+00 : f32
    %75 = vector.broadcast %cst_37 : f32 to vector<1x32xf32>
    %76 = arith.maximumf %74, %75 : vector<1x32xf32>
    %77 = vector.broadcast %67 : vector<1x32xf32> to vector<16x32xf32>
    %78 = arith.subf %63, %77 : vector<16x32xf32>
    %cst_38 = arith.constant 9.99999974E-6 : f32
    %79 = vector.broadcast %cst_38 : f32 to vector<1x32xf32>
    %80 = arith.addf %76, %79 : vector<1x32xf32>
    %81 = math.rsqrt %80 : vector<1x32xf32>
    %82 = vector.broadcast %81 : vector<1x32xf32> to vector<16x32xf32>
    %83 = arith.mulf %78, %82 : vector<16x32xf32>
    %84 = vector.shape_cast %52 : vector<32xf32> to vector<1x32xf32>
    %85 = vector.broadcast %84 : vector<1x32xf32> to vector<16x32xf32>
    %86 = arith.mulf %83, %85 : vector<16x32xf32>
    %87 = vector.shape_cast %54 : vector<32xf32> to vector<1x32xf32>
    %88 = vector.broadcast %87 : vector<1x32xf32> to vector<16x32xf32>
    %89 = arith.addf %86, %88 : vector<16x32xf32>
    %90 = arith.addf %89, %44 : vector<16x32xf32>
    %91 = arith.truncf %90 : vector<16x32xf32> to vector<16x32xbf16>
    %c0_39 = arith.constant 0 : index
    %c32 = arith.constant 32 : index
    %92 = vector.load %arg18[%c0_39, %c32] : memref<16x256xbf16, #tpu.memory_space<vmem>>, vector<16x32xbf16>
    tpu.vector_store %arg18[%c0_39, %c32], %91 {strides = array<i32>} : memref<16x256xbf16, #tpu.memory_space<vmem>>, vector<16x32xbf16>,
    %c1 = arith.constant 1 : index
    %c0_40 = arith.constant 0 : index
    %c0_41 = arith.constant 0 : index
    %93 = vector.load %arg6[%c1, %c0_40, %c0_41] : memref<7x64x32xbf16, #tpu.memory_space<vmem>>, vector<1x64x32xbf16>
    %94 = vector.shape_cast %93 : vector<1x64x32xbf16> to vector<64x32xbf16>
    %c1_42 = arith.constant 1 : index
    %c0_43 = arith.constant 0 : index
    %95 = vector.load %arg7[%c1_42, %c0_43] : memref<7x32xf32, #tpu.memory_space<vmem>>, vector<1x32xf32>
    %96 = vector.shape_cast %95 : vector<1x32xf32> to vector<32xf32>
    %c1_44 = arith.constant 1 : index
    %c0_45 = arith.constant 0 : index
    %97 = vector.load %arg8[%c1_44, %c0_45] : memref<7x32xf32, #tpu.memory_space<vmem>>, vector<1x32xf32>
    %98 = vector.shape_cast %97 : vector<1x32xf32> to vector<32xf32>
    %c1_46 = arith.constant 1 : index
    %c0_47 = arith.constant 0 : index
    %99 = vector.load %arg9[%c1_46, %c0_47] : memref<7x32xf32, #tpu.memory_space<vmem>>, vector<1x32xf32>
    %100 = vector.shape_cast %99 : vector<1x32xf32> to vector<32xf32>
    %cst_48 = arith.constant dense<0.000000e+00> : vector<16x32xf32>
    %101 = tpu.matmul %0, %91, %cst_48 {dimension_numbers = #tpu.dot_dimension_numbers<[1], [0], [0], [1], [0, 0, 1, 1], [], []>} : vector<16x16xbf16>, vector<16x32xbf16>, vector<16x32xf32> -> vector<16x32xf32>
    %102 = arith.truncf %101 : vector<16x32xf32> to vector<16x32xbf16>
    %103 = tpu.concatenate %91, %102 in 1 : vector<16x32xbf16>, vector<16x32xbf16> -> vector<16x64xbf16>
    %cst_49 = arith.constant dense<0.000000e+00> : vector<16x32xf32>
    %104 = tpu.matmul %103, %94, %cst_49 {dimension_numbers = #tpu.dot_dimension_numbers<[1], [0], [0], [1], [0, 0, 1, 1], [], []>} : vector<16x64xbf16>, vector<64x32xbf16>, vector<16x32xf32> -> vector<16x32xf32>
    %105 = vector.shape_cast %96 : vector<32xf32> to vector<1x32xf32>
    %106 = vector.broadcast %105 : vector<1x32xf32> to vector<16x32xf32>
    %107 = arith.addf %104, %106 : vector<16x32xf32>
    %cst_50 = arith.constant 0.000000e+00 : f32
    %108 = vector.broadcast %cst_50 : f32 to vector<16x32xf32>
    %109 = arith.maximumf %107, %108 : vector<16x32xf32>
    %cst_51 = arith.constant dense<0.000000e+00> : vector<32xf32>
    %110 = vector.multi_reduction <add>, %109, %cst_51 [0] : vector<16x32xf32> to vector<32xf32>
    %111 = vector.shape_cast %110 : vector<32xf32> to vector<1x32xf32>
    %cst_52 = arith.constant 1.600000e+01 : f32
    %112 = vector.broadcast %cst_52 : f32 to vector<1x32xf32>
    %113 = arith.divf %111, %112 : vector<1x32xf32>
    %114 = arith.mulf %109, %109 : vector<16x32xf32>
    %cst_53 = arith.constant dense<0.000000e+00> : vector<32xf32>
    %115 = vector.multi_reduction <add>, %114, %cst_53 [0] : vector<16x32xf32> to vector<32xf32>
    %116 = vector.shape_cast %115 : vector<32xf32> to vector<1x32xf32>
    %cst_54 = arith.constant 1.600000e+01 : f32
    %117 = vector.broadcast %cst_54 : f32 to vector<1x32xf32>
    %118 = arith.divf %116, %117 : vector<1x32xf32>
    %119 = arith.mulf %113, %113 : vector<1x32xf32>
    %120 = arith.subf %118, %119 : vector<1x32xf32>
    %cst_55 = arith.constant 0.000000e+00 : f32
    %121 = vector.broadcast %cst_55 : f32 to vector<1x32xf32>
    %122 = arith.maximumf %120, %121 : vector<1x32xf32>
    %123 = vector.broadcast %113 : vector<1x32xf32> to vector<16x32xf32>
    %124 = arith.subf %109, %123 : vector<16x32xf32>
    %cst_56 = arith.constant 9.99999974E-6 : f32
    %125 = vector.broadcast %cst_56 : f32 to vector<1x32xf32>
    %126 = arith.addf %122, %125 : vector<1x32xf32>
    %127 = math.rsqrt %126 : vector<1x32xf32>
    %128 = vector.broadcast %127 : vector<1x32xf32> to vector<16x32xf32>
    %129 = arith.mulf %124, %128 : vector<16x32xf32>
    %130 = vector.shape_cast %98 : vector<32xf32> to vector<1x32xf32>
    %131 = vector.broadcast %130 : vector<1x32xf32> to vector<16x32xf32>
    %132 = arith.mulf %129, %131 : vector<16x32xf32>
    %133 = vector.shape_cast %100 : vector<32xf32> to vector<1x32xf32>
    %134 = vector.broadcast %133 : vector<1x32xf32> to vector<16x32xf32>
    %135 = arith.addf %132, %134 : vector<16x32xf32>
    %136 = arith.addf %135, %90 : vector<16x32xf32>
    %137 = arith.truncf %136 : vector<16x32xf32> to vector<16x32xbf16>
    %c0_57 = arith.constant 0 : index
    %c64 = arith.constant 64 : index
    %138 = vector.load %arg18[%c0_57, %c64] : memref<16x256xbf16, #tpu.memory_space<vmem>>, vector<16x32xbf16>
    tpu.vector_store %arg18[%c0_57, %c64], %137 {strides = array<i32>} : memref<16x256xbf16, #tpu.memory_space<vmem>>, vector<16x32xbf16>,
    %c2 = arith.constant 2 : index
    %c0_58 = arith.constant 0 : index
    %c0_59 = arith.constant 0 : index
    %139 = vector.load %arg6[%c2, %c0_58, %c0_59] : memref<7x64x32xbf16, #tpu.memory_space<vmem>>, vector<1x64x32xbf16>
    %140 = vector.shape_cast %139 : vector<1x64x32xbf16> to vector<64x32xbf16>
    %c2_60 = arith.constant 2 : index
    %c0_61 = arith.constant 0 : index
    %141 = vector.load %arg7[%c2_60, %c0_61] : memref<7x32xf32, #tpu.memory_space<vmem>>, vector<1x32xf32>
    %142 = vector.shape_cast %141 : vector<1x32xf32> to vector<32xf32>
    %c2_62 = arith.constant 2 : index
    %c0_63 = arith.constant 0 : index
    %143 = vector.load %arg8[%c2_62, %c0_63] : memref<7x32xf32, #tpu.memory_space<vmem>>, vector<1x32xf32>
    %144 = vector.shape_cast %143 : vector<1x32xf32> to vector<32xf32>
    %c2_64 = arith.constant 2 : index
    %c0_65 = arith.constant 0 : index
    %145 = vector.load %arg9[%c2_64, %c0_65] : memref<7x32xf32, #tpu.memory_space<vmem>>, vector<1x32xf32>
    %146 = vector.shape_cast %145 : vector<1x32xf32> to vector<32xf32>
    %cst_66 = arith.constant dense<0.000000e+00> : vector<16x32xf32>
    %147 = tpu.matmul %0, %137, %cst_66 {dimension_numbers = #tpu.dot_dimension_numbers<[1], [0], [0], [1], [0, 0, 1, 1], [], []>} : vector<16x16xbf16>, vector<16x32xbf16>, vector<16x32xf32> -> vector<16x32xf32>
    %148 = arith.truncf %147 : vector<16x32xf32> to vector<16x32xbf16>
    %149 = tpu.concatenate %137, %148 in 1 : vector<16x32xbf16>, vector<16x32xbf16> -> vector<16x64xbf16>
    %cst_67 = arith.constant dense<0.000000e+00> : vector<16x32xf32>
    %150 = tpu.matmul %149, %140, %cst_67 {dimension_numbers = #tpu.dot_dimension_numbers<[1], [0], [0], [1], [0, 0, 1, 1], [], []>} : vector<16x64xbf16>, vector<64x32xbf16>, vector<16x32xf32> -> vector<16x32xf32>
    %151 = vector.shape_cast %142 : vector<32xf32> to vector<1x32xf32>
    %152 = vector.broadcast %151 : vector<1x32xf32> to vector<16x32xf32>
    %153 = arith.addf %150, %152 : vector<16x32xf32>
    %cst_68 = arith.constant 0.000000e+00 : f32
    %154 = vector.broadcast %cst_68 : f32 to vector<16x32xf32>
    %155 = arith.maximumf %153, %154 : vector<16x32xf32>
    %cst_69 = arith.constant dense<0.000000e+00> : vector<32xf32>
    %156 = vector.multi_reduction <add>, %155, %cst_69 [0] : vector<16x32xf32> to vector<32xf32>
    %157 = vector.shape_cast %156 : vector<32xf32> to vector<1x32xf32>
    %cst_70 = arith.constant 1.600000e+01 : f32
    %158 = vector.broadcast %cst_70 : f32 to vector<1x32xf32>
    %159 = arith.divf %157, %158 : vector<1x32xf32>
    %160 = arith.mulf %155, %155 : vector<16x32xf32>
    %cst_71 = arith.constant dense<0.000000e+00> : vector<32xf32>
    %161 = vector.multi_reduction <add>, %160, %cst_71 [0] : vector<16x32xf32> to vector<32xf32>
    %162 = vector.shape_cast %161 : vector<32xf32> to vector<1x32xf32>
    %cst_72 = arith.constant 1.600000e+01 : f32
    %163 = vector.broadcast %cst_72 : f32 to vector<1x32xf32>
    %164 = arith.divf %162, %163 : vector<1x32xf32>
    %165 = arith.mulf %159, %159 : vector<1x32xf32>
    %166 = arith.subf %164, %165 : vector<1x32xf32>
    %cst_73 = arith.constant 0.000000e+00 : f32
    %167 = vector.broadcast %cst_73 : f32 to vector<1x32xf32>
    %168 = arith.maximumf %166, %167 : vector<1x32xf32>
    %169 = vector.broadcast %159 : vector<1x32xf32> to vector<16x32xf32>
    %170 = arith.subf %155, %169 : vector<16x32xf32>
    %cst_74 = arith.constant 9.99999974E-6 : f32
    %171 = vector.broadcast %cst_74 : f32 to vector<1x32xf32>
    %172 = arith.addf %168, %171 : vector<1x32xf32>
    %173 = math.rsqrt %172 : vector<1x32xf32>
    %174 = vector.broadcast %173 : vector<1x32xf32> to vector<16x32xf32>
    %175 = arith.mulf %170, %174 : vector<16x32xf32>
    %176 = vector.shape_cast %144 : vector<32xf32> to vector<1x32xf32>
    %177 = vector.broadcast %176 : vector<1x32xf32> to vector<16x32xf32>
    %178 = arith.mulf %175, %177 : vector<16x32xf32>
    %179 = vector.shape_cast %146 : vector<32xf32> to vector<1x32xf32>
    %180 = vector.broadcast %179 : vector<1x32xf32> to vector<16x32xf32>
    %181 = arith.addf %178, %180 : vector<16x32xf32>
    %182 = arith.addf %181, %136 : vector<16x32xf32>
    %183 = arith.truncf %182 : vector<16x32xf32> to vector<16x32xbf16>
    %c0_75 = arith.constant 0 : index
    %c96 = arith.constant 96 : index
    %184 = vector.load %arg18[%c0_75, %c96] : memref<16x256xbf16, #tpu.memory_space<vmem>>, vector<16x32xbf16>
    tpu.vector_store %arg18[%c0_75, %c96], %183 {strides = array<i32>} : memref<16x256xbf16, #tpu.memory_space<vmem>>, vector<16x32xbf16>,
    %c3 = arith.constant 3 : index
    %c0_76 = arith.constant 0 : index
    %c0_77 = arith.constant 0 : index
    %185 = vector.load %arg6[%c3, %c0_76, %c0_77] : memref<7x64x32xbf16, #tpu.memory_space<vmem>>, vector<1x64x32xbf16>
    %186 = vector.shape_cast %185 : vector<1x64x32xbf16> to vector<64x32xbf16>
    %c3_78 = arith.constant 3 : index
    %c0_79 = arith.constant 0 : index
    %187 = vector.load %arg7[%c3_78, %c0_79] : memref<7x32xf32, #tpu.memory_space<vmem>>, vector<1x32xf32>
    %188 = vector.shape_cast %187 : vector<1x32xf32> to vector<32xf32>
    %c3_80 = arith.constant 3 : index
    %c0_81 = arith.constant 0 : index
    %189 = vector.load %arg8[%c3_80, %c0_81] : memref<7x32xf32, #tpu.memory_space<vmem>>, vector<1x32xf32>
    %190 = vector.shape_cast %189 : vector<1x32xf32> to vector<32xf32>
    %c3_82 = arith.constant 3 : index
    %c0_83 = arith.constant 0 : index
    %191 = vector.load %arg9[%c3_82, %c0_83] : memref<7x32xf32, #tpu.memory_space<vmem>>, vector<1x32xf32>
    %192 = vector.shape_cast %191 : vector<1x32xf32> to vector<32xf32>
    %cst_84 = arith.constant dense<0.000000e+00> : vector<16x32xf32>
    %193 = tpu.matmul %0, %183, %cst_84 {dimension_numbers = #tpu.dot_dimension_numbers<[1], [0], [0], [1], [0, 0, 1, 1], [], []>} : vector<16x16xbf16>, vector<16x32xbf16>, vector<16x32xf32> -> vector<16x32xf32>
    %194 = arith.truncf %193 : vector<16x32xf32> to vector<16x32xbf16>
    %195 = tpu.concatenate %183, %194 in 1 : vector<16x32xbf16>, vector<16x32xbf16> -> vector<16x64xbf16>
    %cst_85 = arith.constant dense<0.000000e+00> : vector<16x32xf32>
    %196 = tpu.matmul %195, %186, %cst_85 {dimension_numbers = #tpu.dot_dimension_numbers<[1], [0], [0], [1], [0, 0, 1, 1], [], []>} : vector<16x64xbf16>, vector<64x32xbf16>, vector<16x32xf32> -> vector<16x32xf32>
    %197 = vector.shape_cast %188 : vector<32xf32> to vector<1x32xf32>
    %198 = vector.broadcast %197 : vector<1x32xf32> to vector<16x32xf32>
    %199 = arith.addf %196, %198 : vector<16x32xf32>
    %cst_86 = arith.constant 0.000000e+00 : f32
    %200 = vector.broadcast %cst_86 : f32 to vector<16x32xf32>
    %201 = arith.maximumf %199, %200 : vector<16x32xf32>
    %cst_87 = arith.constant dense<0.000000e+00> : vector<32xf32>
    %202 = vector.multi_reduction <add>, %201, %cst_87 [0] : vector<16x32xf32> to vector<32xf32>
    %203 = vector.shape_cast %202 : vector<32xf32> to vector<1x32xf32>
    %cst_88 = arith.constant 1.600000e+01 : f32
    %204 = vector.broadcast %cst_88 : f32 to vector<1x32xf32>
    %205 = arith.divf %203, %204 : vector<1x32xf32>
    %206 = arith.mulf %201, %201 : vector<16x32xf32>
    %cst_89 = arith.constant dense<0.000000e+00> : vector<32xf32>
    %207 = vector.multi_reduction <add>, %206, %cst_89 [0] : vector<16x32xf32> to vector<32xf32>
    %208 = vector.shape_cast %207 : vector<32xf32> to vector<1x32xf32>
    %cst_90 = arith.constant 1.600000e+01 : f32
    %209 = vector.broadcast %cst_90 : f32 to vector<1x32xf32>
    %210 = arith.divf %208, %209 : vector<1x32xf32>
    %211 = arith.mulf %205, %205 : vector<1x32xf32>
    %212 = arith.subf %210, %211 : vector<1x32xf32>
    %cst_91 = arith.constant 0.000000e+00 : f32
    %213 = vector.broadcast %cst_91 : f32 to vector<1x32xf32>
    %214 = arith.maximumf %212, %213 : vector<1x32xf32>
    %215 = vector.broadcast %205 : vector<1x32xf32> to vector<16x32xf32>
    %216 = arith.subf %201, %215 : vector<16x32xf32>
    %cst_92 = arith.constant 9.99999974E-6 : f32
    %217 = vector.broadcast %cst_92 : f32 to vector<1x32xf32>
    %218 = arith.addf %214, %217 : vector<1x32xf32>
    %219 = math.rsqrt %218 : vector<1x32xf32>
    %220 = vector.broadcast %219 : vector<1x32xf32> to vector<16x32xf32>
    %221 = arith.mulf %216, %220 : vector<16x32xf32>
    %222 = vector.shape_cast %190 : vector<32xf32> to vector<1x32xf32>
    %223 = vector.broadcast %222 : vector<1x32xf32> to vector<16x32xf32>
    %224 = arith.mulf %221, %223 : vector<16x32xf32>
    %225 = vector.shape_cast %192 : vector<32xf32> to vector<1x32xf32>
    %226 = vector.broadcast %225 : vector<1x32xf32> to vector<16x32xf32>
    %227 = arith.addf %224, %226 : vector<16x32xf32>
    %228 = arith.addf %227, %182 : vector<16x32xf32>
    %229 = arith.truncf %228 : vector<16x32xf32> to vector<16x32xbf16>
    %c0_93 = arith.constant 0 : index
    %c128 = arith.constant 128 : index
    %230 = vector.load %arg18[%c0_93, %c128] : memref<16x256xbf16, #tpu.memory_space<vmem>>, vector<16x32xbf16>
    tpu.vector_store %arg18[%c0_93, %c128], %229 {strides = array<i32>} : memref<16x256xbf16, #tpu.memory_space<vmem>>, vector<16x32xbf16>,
    %c4 = arith.constant 4 : index
    %c0_94 = arith.constant 0 : index
    %c0_95 = arith.constant 0 : index
    %231 = vector.load %arg6[%c4, %c0_94, %c0_95] : memref<7x64x32xbf16, #tpu.memory_space<vmem>>, vector<1x64x32xbf16>
    %232 = vector.shape_cast %231 : vector<1x64x32xbf16> to vector<64x32xbf16>
    %c4_96 = arith.constant 4 : index
    %c0_97 = arith.constant 0 : index
    %233 = vector.load %arg7[%c4_96, %c0_97] : memref<7x32xf32, #tpu.memory_space<vmem>>, vector<1x32xf32>
    %234 = vector.shape_cast %233 : vector<1x32xf32> to vector<32xf32>
    %c4_98 = arith.constant 4 : index
    %c0_99 = arith.constant 0 : index
    %235 = vector.load %arg8[%c4_98, %c0_99] : memref<7x32xf32, #tpu.memory_space<vmem>>, vector<1x32xf32>
    %236 = vector.shape_cast %235 : vector<1x32xf32> to vector<32xf32>
    %c4_100 = arith.constant 4 : index
    %c0_101 = arith.constant 0 : index
    %237 = vector.load %arg9[%c4_100, %c0_101] : memref<7x32xf32, #tpu.memory_space<vmem>>, vector<1x32xf32>
    %238 = vector.shape_cast %237 : vector<1x32xf32> to vector<32xf32>
    %cst_102 = arith.constant dense<0.000000e+00> : vector<16x32xf32>
    %239 = tpu.matmul %0, %229, %cst_102 {dimension_numbers = #tpu.dot_dimension_numbers<[1], [0], [0], [1], [0, 0, 1, 1], [], []>} : vector<16x16xbf16>, vector<16x32xbf16>, vector<16x32xf32> -> vector<16x32xf32>
    %240 = arith.truncf %239 : vector<16x32xf32> to vector<16x32xbf16>
    %241 = tpu.concatenate %229, %240 in 1 : vector<16x32xbf16>, vector<16x32xbf16> -> vector<16x64xbf16>
    %cst_103 = arith.constant dense<0.000000e+00> : vector<16x32xf32>
    %242 = tpu.matmul %241, %232, %cst_103 {dimension_numbers = #tpu.dot_dimension_numbers<[1], [0], [0], [1], [0, 0, 1, 1], [], []>} : vector<16x64xbf16>, vector<64x32xbf16>, vector<16x32xf32> -> vector<16x32xf32>
    %243 = vector.shape_cast %234 : vector<32xf32> to vector<1x32xf32>
    %244 = vector.broadcast %243 : vector<1x32xf32> to vector<16x32xf32>
    %245 = arith.addf %242, %244 : vector<16x32xf32>
    %cst_104 = arith.constant 0.000000e+00 : f32
    %246 = vector.broadcast %cst_104 : f32 to vector<16x32xf32>
    %247 = arith.maximumf %245, %246 : vector<16x32xf32>
    %cst_105 = arith.constant dense<0.000000e+00> : vector<32xf32>
    %248 = vector.multi_reduction <add>, %247, %cst_105 [0] : vector<16x32xf32> to vector<32xf32>
    %249 = vector.shape_cast %248 : vector<32xf32> to vector<1x32xf32>
    %cst_106 = arith.constant 1.600000e+01 : f32
    %250 = vector.broadcast %cst_106 : f32 to vector<1x32xf32>
    %251 = arith.divf %249, %250 : vector<1x32xf32>
    %252 = arith.mulf %247, %247 : vector<16x32xf32>
    %cst_107 = arith.constant dense<0.000000e+00> : vector<32xf32>
    %253 = vector.multi_reduction <add>, %252, %cst_107 [0] : vector<16x32xf32> to vector<32xf32>
    %254 = vector.shape_cast %253 : vector<32xf32> to vector<1x32xf32>
    %cst_108 = arith.constant 1.600000e+01 : f32
    %255 = vector.broadcast %cst_108 : f32 to vector<1x32xf32>
    %256 = arith.divf %254, %255 : vector<1x32xf32>
    %257 = arith.mulf %251, %251 : vector<1x32xf32>
    %258 = arith.subf %256, %257 : vector<1x32xf32>
    %cst_109 = arith.constant 0.000000e+00 : f32
    %259 = vector.broadcast %cst_109 : f32 to vector<1x32xf32>
    %260 = arith.maximumf %258, %259 : vector<1x32xf32>
    %261 = vector.broadcast %251 : vector<1x32xf32> to vector<16x32xf32>
    %262 = arith.subf %247, %261 : vector<16x32xf32>
    %cst_110 = arith.constant 9.99999974E-6 : f32
    %263 = vector.broadcast %cst_110 : f32 to vector<1x32xf32>
    %264 = arith.addf %260, %263 : vector<1x32xf32>
    %265 = math.rsqrt %264 : vector<1x32xf32>
    %266 = vector.broadcast %265 : vector<1x32xf32> to vector<16x32xf32>
    %267 = arith.mulf %262, %266 : vector<16x32xf32>
    %268 = vector.shape_cast %236 : vector<32xf32> to vector<1x32xf32>
    %269 = vector.broadcast %268 : vector<1x32xf32> to vector<16x32xf32>
    %270 = arith.mulf %267, %269 : vector<16x32xf32>
    %271 = vector.shape_cast %238 : vector<32xf32> to vector<1x32xf32>
    %272 = vector.broadcast %271 : vector<1x32xf32> to vector<16x32xf32>
    %273 = arith.addf %270, %272 : vector<16x32xf32>
    %274 = arith.addf %273, %228 : vector<16x32xf32>
    %275 = arith.truncf %274 : vector<16x32xf32> to vector<16x32xbf16>
    %c0_111 = arith.constant 0 : index
    %c160 = arith.constant 160 : index
    %276 = vector.load %arg18[%c0_111, %c160] : memref<16x256xbf16, #tpu.memory_space<vmem>>, vector<16x32xbf16>
    tpu.vector_store %arg18[%c0_111, %c160], %275 {strides = array<i32>} : memref<16x256xbf16, #tpu.memory_space<vmem>>, vector<16x32xbf16>,
    %c5 = arith.constant 5 : index
    %c0_112 = arith.constant 0 : index
    %c0_113 = arith.constant 0 : index
    %277 = vector.load %arg6[%c5, %c0_112, %c0_113] : memref<7x64x32xbf16, #tpu.memory_space<vmem>>, vector<1x64x32xbf16>
    %278 = vector.shape_cast %277 : vector<1x64x32xbf16> to vector<64x32xbf16>
    %c5_114 = arith.constant 5 : index
    %c0_115 = arith.constant 0 : index
    %279 = vector.load %arg7[%c5_114, %c0_115] : memref<7x32xf32, #tpu.memory_space<vmem>>, vector<1x32xf32>
    %280 = vector.shape_cast %279 : vector<1x32xf32> to vector<32xf32>
    %c5_116 = arith.constant 5 : index
    %c0_117 = arith.constant 0 : index
    %281 = vector.load %arg8[%c5_116, %c0_117] : memref<7x32xf32, #tpu.memory_space<vmem>>, vector<1x32xf32>
    %282 = vector.shape_cast %281 : vector<1x32xf32> to vector<32xf32>
    %c5_118 = arith.constant 5 : index
    %c0_119 = arith.constant 0 : index
    %283 = vector.load %arg9[%c5_118, %c0_119] : memref<7x32xf32, #tpu.memory_space<vmem>>, vector<1x32xf32>
    %284 = vector.shape_cast %283 : vector<1x32xf32> to vector<32xf32>
    %cst_120 = arith.constant dense<0.000000e+00> : vector<16x32xf32>
    %285 = tpu.matmul %0, %275, %cst_120 {dimension_numbers = #tpu.dot_dimension_numbers<[1], [0], [0], [1], [0, 0, 1, 1], [], []>} : vector<16x16xbf16>, vector<16x32xbf16>, vector<16x32xf32> -> vector<16x32xf32>
    %286 = arith.truncf %285 : vector<16x32xf32> to vector<16x32xbf16>
    %287 = tpu.concatenate %275, %286 in 1 : vector<16x32xbf16>, vector<16x32xbf16> -> vector<16x64xbf16>
    %cst_121 = arith.constant dense<0.000000e+00> : vector<16x32xf32>
    %288 = tpu.matmul %287, %278, %cst_121 {dimension_numbers = #tpu.dot_dimension_numbers<[1], [0], [0], [1], [0, 0, 1, 1], [], []>} : vector<16x64xbf16>, vector<64x32xbf16>, vector<16x32xf32> -> vector<16x32xf32>
    %289 = vector.shape_cast %280 : vector<32xf32> to vector<1x32xf32>
    %290 = vector.broadcast %289 : vector<1x32xf32> to vector<16x32xf32>
    %291 = arith.addf %288, %290 : vector<16x32xf32>
    %cst_122 = arith.constant 0.000000e+00 : f32
    %292 = vector.broadcast %cst_122 : f32 to vector<16x32xf32>
    %293 = arith.maximumf %291, %292 : vector<16x32xf32>
    %cst_123 = arith.constant dense<0.000000e+00> : vector<32xf32>
    %294 = vector.multi_reduction <add>, %293, %cst_123 [0] : vector<16x32xf32> to vector<32xf32>
    %295 = vector.shape_cast %294 : vector<32xf32> to vector<1x32xf32>
    %cst_124 = arith.constant 1.600000e+01 : f32
    %296 = vector.broadcast %cst_124 : f32 to vector<1x32xf32>
    %297 = arith.divf %295, %296 : vector<1x32xf32>
    %298 = arith.mulf %293, %293 : vector<16x32xf32>
    %cst_125 = arith.constant dense<0.000000e+00> : vector<32xf32>
    %299 = vector.multi_reduction <add>, %298, %cst_125 [0] : vector<16x32xf32> to vector<32xf32>
    %300 = vector.shape_cast %299 : vector<32xf32> to vector<1x32xf32>
    %cst_126 = arith.constant 1.600000e+01 : f32
    %301 = vector.broadcast %cst_126 : f32 to vector<1x32xf32>
    %302 = arith.divf %300, %301 : vector<1x32xf32>
    %303 = arith.mulf %297, %297 : vector<1x32xf32>
    %304 = arith.subf %302, %303 : vector<1x32xf32>
    %cst_127 = arith.constant 0.000000e+00 : f32
    %305 = vector.broadcast %cst_127 : f32 to vector<1x32xf32>
    %306 = arith.maximumf %304, %305 : vector<1x32xf32>
    %307 = vector.broadcast %297 : vector<1x32xf32> to vector<16x32xf32>
    %308 = arith.subf %293, %307 : vector<16x32xf32>
    %cst_128 = arith.constant 9.99999974E-6 : f32
    %309 = vector.broadcast %cst_128 : f32 to vector<1x32xf32>
    %310 = arith.addf %306, %309 : vector<1x32xf32>
    %311 = math.rsqrt %310 : vector<1x32xf32>
    %312 = vector.broadcast %311 : vector<1x32xf32> to vector<16x32xf32>
    %313 = arith.mulf %308, %312 : vector<16x32xf32>
    %314 = vector.shape_cast %282 : vector<32xf32> to vector<1x32xf32>
    %315 = vector.broadcast %314 : vector<1x32xf32> to vector<16x32xf32>
    %316 = arith.mulf %313, %315 : vector<16x32xf32>
    %317 = vector.shape_cast %284 : vector<32xf32> to vector<1x32xf32>
    %318 = vector.broadcast %317 : vector<1x32xf32> to vector<16x32xf32>
    %319 = arith.addf %316, %318 : vector<16x32xf32>
    %320 = arith.addf %319, %274 : vector<16x32xf32>
    %321 = arith.truncf %320 : vector<16x32xf32> to vector<16x32xbf16>
    %c0_129 = arith.constant 0 : index
    %c192 = arith.constant 192 : index
    %322 = vector.load %arg18[%c0_129, %c192] : memref<16x256xbf16, #tpu.memory_space<vmem>>, vector<16x32xbf16>
    tpu.vector_store %arg18[%c0_129, %c192], %321 {strides = array<i32>} : memref<16x256xbf16, #tpu.memory_space<vmem>>, vector<16x32xbf16>,
    %c6 = arith.constant 6 : index
    %c0_130 = arith.constant 0 : index
    %c0_131 = arith.constant 0 : index
    %323 = vector.load %arg6[%c6, %c0_130, %c0_131] : memref<7x64x32xbf16, #tpu.memory_space<vmem>>, vector<1x64x32xbf16>
    %324 = vector.shape_cast %323 : vector<1x64x32xbf16> to vector<64x32xbf16>
    %c6_132 = arith.constant 6 : index
    %c0_133 = arith.constant 0 : index
    %325 = vector.load %arg7[%c6_132, %c0_133] : memref<7x32xf32, #tpu.memory_space<vmem>>, vector<1x32xf32>
    %326 = vector.shape_cast %325 : vector<1x32xf32> to vector<32xf32>
    %c6_134 = arith.constant 6 : index
    %c0_135 = arith.constant 0 : index
    %327 = vector.load %arg8[%c6_134, %c0_135] : memref<7x32xf32, #tpu.memory_space<vmem>>, vector<1x32xf32>
    %328 = vector.shape_cast %327 : vector<1x32xf32> to vector<32xf32>
    %c6_136 = arith.constant 6 : index
    %c0_137 = arith.constant 0 : index
    %329 = vector.load %arg9[%c6_136, %c0_137] : memref<7x32xf32, #tpu.memory_space<vmem>>, vector<1x32xf32>
    %330 = vector.shape_cast %329 : vector<1x32xf32> to vector<32xf32>
    %cst_138 = arith.constant dense<0.000000e+00> : vector<16x32xf32>
    %331 = tpu.matmul %0, %321, %cst_138 {dimension_numbers = #tpu.dot_dimension_numbers<[1], [0], [0], [1], [0, 0, 1, 1], [], []>} : vector<16x16xbf16>, vector<16x32xbf16>, vector<16x32xf32> -> vector<16x32xf32>
    %332 = arith.truncf %331 : vector<16x32xf32> to vector<16x32xbf16>
    %333 = tpu.concatenate %321, %332 in 1 : vector<16x32xbf16>, vector<16x32xbf16> -> vector<16x64xbf16>
    %cst_139 = arith.constant dense<0.000000e+00> : vector<16x32xf32>
    %334 = tpu.matmul %333, %324, %cst_139 {dimension_numbers = #tpu.dot_dimension_numbers<[1], [0], [0], [1], [0, 0, 1, 1], [], []>} : vector<16x64xbf16>, vector<64x32xbf16>, vector<16x32xf32> -> vector<16x32xf32>
    %335 = vector.shape_cast %326 : vector<32xf32> to vector<1x32xf32>
    %336 = vector.broadcast %335 : vector<1x32xf32> to vector<16x32xf32>
    %337 = arith.addf %334, %336 : vector<16x32xf32>
    %cst_140 = arith.constant 0.000000e+00 : f32
    %338 = vector.broadcast %cst_140 : f32 to vector<16x32xf32>
    %339 = arith.maximumf %337, %338 : vector<16x32xf32>
    %cst_141 = arith.constant dense<0.000000e+00> : vector<32xf32>
    %340 = vector.multi_reduction <add>, %339, %cst_141 [0] : vector<16x32xf32> to vector<32xf32>
    %341 = vector.shape_cast %340 : vector<32xf32> to vector<1x32xf32>
    %cst_142 = arith.constant 1.600000e+01 : f32
    %342 = vector.broadcast %cst_142 : f32 to vector<1x32xf32>
    %343 = arith.divf %341, %342 : vector<1x32xf32>
    %344 = arith.mulf %339, %339 : vector<16x32xf32>
    %cst_143 = arith.constant dense<0.000000e+00> : vector<32xf32>
    %345 = vector.multi_reduction <add>, %344, %cst_143 [0] : vector<16x32xf32> to vector<32xf32>
    %346 = vector.shape_cast %345 : vector<32xf32> to vector<1x32xf32>
    %cst_144 = arith.constant 1.600000e+01 : f32
    %347 = vector.broadcast %cst_144 : f32 to vector<1x32xf32>
    %348 = arith.divf %346, %347 : vector<1x32xf32>
    %349 = arith.mulf %343, %343 : vector<1x32xf32>
    %350 = arith.subf %348, %349 : vector<1x32xf32>
    %cst_145 = arith.constant 0.000000e+00 : f32
    %351 = vector.broadcast %cst_145 : f32 to vector<1x32xf32>
    %352 = arith.maximumf %350, %351 : vector<1x32xf32>
    %353 = vector.broadcast %343 : vector<1x32xf32> to vector<16x32xf32>
    %354 = arith.subf %339, %353 : vector<16x32xf32>
    %cst_146 = arith.constant 9.99999974E-6 : f32
    %355 = vector.broadcast %cst_146 : f32 to vector<1x32xf32>
    %356 = arith.addf %352, %355 : vector<1x32xf32>
    %357 = math.rsqrt %356 : vector<1x32xf32>
    %358 = vector.broadcast %357 : vector<1x32xf32> to vector<16x32xf32>
    %359 = arith.mulf %354, %358 : vector<16x32xf32>
    %360 = vector.shape_cast %328 : vector<32xf32> to vector<1x32xf32>
    %361 = vector.broadcast %360 : vector<1x32xf32> to vector<16x32xf32>
    %362 = arith.mulf %359, %361 : vector<16x32xf32>
    %363 = vector.shape_cast %330 : vector<32xf32> to vector<1x32xf32>
    %364 = vector.broadcast %363 : vector<1x32xf32> to vector<16x32xf32>
    %365 = arith.addf %362, %364 : vector<16x32xf32>
    %366 = arith.addf %365, %320 : vector<16x32xf32>
    %367 = arith.truncf %366 : vector<16x32xf32> to vector<16x32xbf16>
    %c0_147 = arith.constant 0 : index
    %c224 = arith.constant 224 : index
    %368 = vector.load %arg18[%c0_147, %c224] : memref<16x256xbf16, #tpu.memory_space<vmem>>, vector<16x32xbf16>
    tpu.vector_store %arg18[%c0_147, %c224], %367 {strides = array<i32>} : memref<16x256xbf16, #tpu.memory_space<vmem>>, vector<16x32xbf16>,
    %c0_148 = arith.constant 0 : index
    %c0_149 = arith.constant 0 : index
    %369 = vector.load %arg18[%c0_148, %c0_149] : memref<16x256xbf16, #tpu.memory_space<vmem>>, vector<16x256xbf16>
    %c0_150 = arith.constant 0 : index
    %c0_151 = arith.constant 0 : index
    %370 = vector.load %arg10[%c0_150, %c0_151] : memref<256x512xbf16, #tpu.memory_space<vmem>>, vector<256x512xbf16>
    %cst_152 = arith.constant dense<0.000000e+00> : vector<16x512xf32>
    %371 = tpu.matmul %369, %370, %cst_152 {dimension_numbers = #tpu.dot_dimension_numbers<[1], [0], [0], [1], [0, 0, 1, 1], [], []>} : vector<16x256xbf16>, vector<256x512xbf16>, vector<16x512xf32> -> vector<16x512xf32>
    %c0_153 = arith.constant 0 : index
    %c0_154 = arith.constant 0 : index
    %372 = vector.load %arg11[%c0_153, %c0_154] : memref<1x512xf32, #tpu.memory_space<vmem>>, vector<1x512xf32>
    %373 = vector.shape_cast %372 : vector<1x512xf32> to vector<512xf32>
    %374 = vector.shape_cast %373 : vector<512xf32> to vector<1x512xf32>
    %375 = vector.broadcast %374 : vector<1x512xf32> to vector<16x512xf32>
    %376 = arith.addf %371, %375 : vector<16x512xf32>
    %377 = vector.extract_strided_slice %376 {offsets = [0, 0], sizes = [16, 256], strides = [1, 1]} : vector<16x512xf32> to vector<16x256xf32>
    %378 = vector.extract_strided_slice %376 {offsets = [0, 256], sizes = [16, 256], strides = [1, 1]} : vector<16x512xf32> to vector<16x256xf32>
    %379 = vector.shape_cast %377 : vector<16x256xf32> to vector<8x2x256xf32>
    %cst_155 = arith.constant dense<0xFF800000> : vector<2x256xf32>
    %380 = vector.multi_reduction <maximumf>, %379, %cst_155 [0] : vector<8x2x256xf32> to vector<2x256xf32>
    %381 = arith.truncf %380 : vector<2x256xf32> to vector<2x256xbf16>
    %c0_156 = arith.constant 0 : index
    %c0_157 = arith.constant 0 : index
    %382 = vector.load %arg12[%c0_156, %c0_157] : memref<256x256xbf16, #tpu.memory_space<vmem>>, vector<256x256xbf16>
    %cst_158 = arith.constant dense<0.000000e+00> : vector<2x256xf32>
    %383 = tpu.matmul %381, %382, %cst_158 {dimension_numbers = #tpu.dot_dimension_numbers<[1], [0], [0], [1], [0, 0, 1, 1], [], []>} : vector<2x256xbf16>, vector<256x256xbf16>, vector<2x256xf32> -> vector<2x256xf32>
    %384 = tpu.concatenate %383, %383, %383, %383, %383, %383, %383, %383 in 0 : vector<2x256xf32>, vector<2x256xf32>, vector<2x256xf32>, vector<2x256xf32>, vector<2x256xf32>, vector<2x256xf32>, vector<2x256xf32>, vector<2x256xf32> -> vector<16x256xf32>
    %385 = arith.addf %378, %384 : vector<16x256xf32>
    %cst_159 = arith.constant 0.000000e+00 : f32
    %386 = vector.broadcast %cst_159 : f32 to vector<16x256xf32>
    %387 = arith.maximumf %385, %386 : vector<16x256xf32>
    %388 = arith.truncf %387 : vector<16x256xf32> to vector<16x256xbf16>
    %c0_160 = arith.constant 0 : index
    %c0_161 = arith.constant 0 : index
    %389 = vector.load %arg13[%c0_160, %c0_161] : memref<256x64xbf16, #tpu.memory_space<vmem>>, vector<256x64xbf16>
    %cst_162 = arith.constant dense<0.000000e+00> : vector<16x64xf32>
    %390 = tpu.matmul %388, %389, %cst_162 {dimension_numbers = #tpu.dot_dimension_numbers<[1], [0], [0], [1], [0, 0, 1, 1], [], []>} : vector<16x256xbf16>, vector<256x64xbf16>, vector<16x64xf32> -> vector<16x64xf32>
    %c0_163 = arith.constant 0 : index
    %c0_164 = arith.constant 0 : index
    %391 = vector.load %arg14[%c0_163, %c0_164] : memref<1x64xf32, #tpu.memory_space<vmem>>, vector<1x64xf32>
    %392 = vector.shape_cast %391 : vector<1x64xf32> to vector<64xf32>
    %393 = vector.shape_cast %392 : vector<64xf32> to vector<1x64xf32>
    %394 = vector.broadcast %393 : vector<1x64xf32> to vector<16x64xf32>
    %395 = arith.addf %390, %394 : vector<16x64xf32>
    %cst_165 = arith.constant 0.000000e+00 : f32
    %396 = vector.broadcast %cst_165 : f32 to vector<16x64xf32>
    %397 = arith.maximumf %395, %396 : vector<16x64xf32>
    %398 = arith.truncf %397 : vector<16x64xf32> to vector<16x64xbf16>
    %c0_166 = arith.constant 0 : index
    %c0_167 = arith.constant 0 : index
    %399 = vector.load %arg15[%c0_166, %c0_167] : memref<64x2xbf16, #tpu.memory_space<vmem>>, vector<64x2xbf16>
    %cst_168 = arith.constant dense<0.000000e+00> : vector<16x2xf32>
    %400 = tpu.matmul %398, %399, %cst_168 {dimension_numbers = #tpu.dot_dimension_numbers<[1], [0], [0], [1], [0, 0, 1, 1], [], []>} : vector<16x64xbf16>, vector<64x2xbf16>, vector<16x2xf32> -> vector<16x2xf32>
    %c0_169 = arith.constant 0 : index
    %c0_170 = arith.constant 0 : index
    %401 = vector.load %arg16[%c0_169, %c0_170] : memref<1x2xf32, #tpu.memory_space<vmem>>, vector<1x2xf32>
    %402 = vector.shape_cast %401 : vector<1x2xf32> to vector<2xf32>
    %403 = vector.shape_cast %402 : vector<2xf32> to vector<1x2xf32>
    %404 = vector.broadcast %403 : vector<1x2xf32> to vector<16x2xf32>
    %405 = arith.addf %400, %404 : vector<16x2xf32>
    %c0_171 = arith.constant 0 : index
    %c0_172 = arith.constant 0 : index
    %406 = vector.load %arg17[%c0_171, %c0_172] : memref<16x2xf32, #tpu.memory_space<vmem>>, vector<16x2xf32>
    tpu.vector_store %arg17[%c0_171, %c0_172], %405 {strides = array<i32>} : memref<16x2xf32, #tpu.memory_space<vmem>>, vector<16x2xf32>,
    return
  }
}

</mosaic_0001>

<bundles_post_ra>
// kernel: tpu_custom_call.1
= control target key start
LH: loop header
LB: loop body
LE: loop exit
PB: predicated region body
PF: predicated region fallthrough
CT: control target
= control target key end

     0   :  { %s4182_s0 = inlined_call_operand.vmem [shape: f32[16,4], index: 0, kind: input, shape index: {}]   ;;  %s4183_s1 = inlined_call_operand.vmem [shape: bf16[16,16], index: 1, kind: input, shape index: {}]   ;;  %s4184_s2 = inlined_call_operand.vmem [shape: bf16[8,32], index: 2, kind: input, shape index: {}]   ;;  %s4185_s3 = inlined_call_operand.vmem [shape: f32[1,32], index: 3, kind: input, shape index: {}]   ;;  %s4186_s4 = inlined_call_operand.vmem [shape: f32[1,32], index: 4, kind: input, shape index: {}]   ;;  %s4187_s5 = inlined_call_operand.vmem [shape: f32[1,32], index: 5, kind: input, shape index: {}]   ;;  %s4188_s6 = inlined_call_operand.vmem [shape: bf16[7,64,32], index: 6, kind: input, shape index: {}]   ;;  %s4189_s7 = inlined_call_operand.vmem [shape: f32[7,32], index: 7, kind: input, shape index: {}]   ;;  %s4190_s8 = inlined_call_operand.vmem [shape: f32[7,32], index: 8, kind: input, shape index: {}]   ;;  %s4191_s9 = inlined_call_operand.vmem [shape: f32[7,32], index: 9, kind: input, shape index: {}]   ;;  %s4192_s10 = inlined_call_operand.vmem [shape: bf16[256,512], index: 10, kind: input, shape index: {}]   ;;  %s4193_s11 = inlined_call_operand.vmem [shape: f32[1,512], index: 11, kind: input, shape index: {}]   ;;  %s4194_s12 = inlined_call_operand.hbm [shape: bf16[256,256], index: 12, kind: input, shape index: {}]   ;;  %s4195_s13 = inlined_call_operand.vmem [shape: bf16[256,64], index: 13, kind: input, shape index: {}]   ;;  %s4196_s14 = inlined_call_operand.vmem [shape: f32[1,64], index: 14, kind: input, shape index: {}]   ;;  %s4197_s15 = inlined_call_operand.vmem [shape: bf16[64,2], index: 15, kind: input, shape index: {}]   ;;  %s4198_s16 = inlined_call_operand.vmem [shape: f32[1,2], index: 16, kind: input, shape index: {}]   ;;  %s4199_s17 = inlined_call_operand.vmem [shape: f32[16,2], index: 17, kind: output, shape index: {}]  }
   0x1   :  { %4202 = sst [smem:[#allocation6_spill]] %s4182_s0 }
   0x2   :  { %4203 = sst [smem:[#allocation7_spill]] %s4183_s1 }
   0x3   :  { %22 = vsyncpa [#allocation4], 0  ;;  %s3349_s24 = smov [#allocation3]   ;;  %s3325_s28 = scalar_lea.hbm %s4194_s12, 4096 }
   0x4   :  { %s52_s25 = sshll.u32 %s3349_s24, 4  ;;  %p3326_p0 = scmp.ne.s32.totalorder %s4194_s12, %s3325_s28  ;;  %s53_s25 = int_to_ptr.vmem [resolvable:$true] %s52_s25 }
   0x5   :  { %p3329_p1 = scmp.lt.u32.totalorder %s3325_s28, %s4194_s12 }
   0x7   :  { %p3331_p2 = pnand %p3329_p1, %p3326_p0 }
   0x9   :  { %3334 = shalt.err (!%p3331_p2)
}
   0xa   :  { %s3335_s19 = scalar_lea.vmem %s53_s25, 4096  ;;  %p3340_p4 = scmp.lt.s32.totalorder %s53_s25, %s53_s25 }
   0xb   :  { %p3336_p3 = scmp.ne.s32.totalorder %s53_s25, %s3335_s19  ;;  %p3341_p5 = scmp.lt.s32.totalorder %s3335_s19, %s3335_s19 }
   0xd   :  { %p3342_p6 = por %p3341_p5, %p3340_p4 }
   0xf   :  { %p3343_p7 = pnand %p3342_p6, %p3336_p3 }
  0x11   :  { %3346 = shalt.err (!%p3343_p7)
}
  0x12   :  { %s3350_s1 = smov 128   ;;  %s3351_s20 = smov 8  }
  0x13   :  { %58 = dma.hbm_to_vmem [thread:$0]  %s4194_s12, 4096, %s53_s25, [#allocation4], %s3350_s1, %s3350_s1, %s3351_s20  }
  0x14   :  { %3347 = dma.done.wait [#allocation4], 4096  }
  0x15   :  { %3348 = vsyncadd [#allocation4], 4294963200  ;;  %v3352_v0 = vmov 0.0   ;;  %vm3353_vm0 = vmmov 0   ;;  %s4204_s26 = sld [smem:[#allocation6_spill]]  ;;  %s4205_s29 = sld [smem:[#allocation7_spill]] }
  0x16   :  { %2955 = vmatprep.subr.bf16.mxu0 %v3352_v0  ;;  %2957 = vmatprep.mubr.msk.bf16.mxu0 %vm3353_vm0, %v3352_v0  ;;  %vm85_vm1 = vcmask 130048   ;;  %v76_v5 = vld [vmem:[%s4184_s2] sm:$0xf]  ;;  %vm147_vm2 = vcmask 1043456   ;;  %s3354_s18 = smov 4   ;;  %vm134_vm3 = vcmask 31744  }
  0x17   :  { %2961 = vmatprep.subr.bf16.mxu1 %v3352_v0  ;;  %2963 = vmatprep.mubr.msk.bf16.mxu1 %vm3353_vm0, %v3352_v0  ;;  %v149_v6 = vsel %vm147_vm2, %v76_v5, 0  ;;  %vm144_vm4 = vcmask 64512   ;;  %v2641_v14 = vld [vmem:[%s4185_s3] ss:$0 sm:$0xff]  ;;  %vm194_vm5 = vcmask 261120   ;;  %v3117_v62 = vld [vmem:[%s4188_s6 + $0x8] sm:$0xff]  }
  0x18   :  { %2962 = vmatpush3.bf16.msra.mxu1 %v149_v6  ;;  %v2643_v52 = vld [vmem:[%s4186_s4] ss:$0 sm:$0xff]  ;;  %v3118_v63 = vld [vmem:[%s4188_s6 + $0x10] sm:$0xff]   ;;  %s3355_s25 = smov 32   ;;  %vm332_vm6 = vcmask 523264   ;;  %vm428_vm7 = vcmask 523520  }
  0x19   :  { %2973 = vmatprep.subr.bf16.mxu1 %v3352_v0  ;;  %v2644_v55 = vld [vmem:[%s4187_s5] ss:$0 sm:$0xff]  ;;  %s3356_s2 = smov 64   ;;  %vm613_vm8 = vcmask 785920   ;;  %s3357_s23 = smov 96   ;;  %vm798_vm9 = vcmask 1048320  }
  0x1a   :  { %v3116_v61 = vld [vmem:[%s4188_s6] sm:$0xff]   ;;  %vm2074_vm10 = vcmask 1041408   ;;  %vm2075_vm11 = vcmask 1043458   ;;  %vm2356_vm13 = vcmask 1045504   ;;  %vm2631_vm14 = vcmask 15360  }
  0x1b   :  { %v73_v1 = vld [vmem:[%s4204_s26] sm:$0xff]  ;;  %v74_v2 = vld [vmem:[%s4204_s26 + $0x8] sm:$0xff]  ;;  %vm4101_vm12 = vmor %vm2075_vm11, %vm2074_vm10 }
  0x1c   :  { %v75_v3 = vpack.c.bf16 %v74_v2, %v73_v1  ;;  %v3476_v4 = vld [vmem:[%s4205_s29] sm:$0xff]   ;;  %v3119_v1 = vld [vmem:[%s4188_s6 + $0x18] sm:$0xff]  }
  0x1e   :  { %2956 = vmatpush3.bf16.msra.mxu0 %v75_v3 }
  0x1f   :  { %2967 = vmatprep.subr.bf16.mxu0 %v3352_v0 }
  0x21   :  { %2958 = vmatmul.mubr.msk.bf16.vlgmr.msra.gmra.mrb[0].mxu0 %vm85_vm1, %v3476_v4 }
  0x22   :  { %2969 = vmatprep.mubr.msk.bf16.mxu0 %vm3353_vm0, %v3352_v0 }
  0xf4   :  { %v123_v7 = vpop.f32.mrb[0].mxu0 }
  0xf5   :  { %v2959_v8 = vpop.f32.mrb[1].mxu0 }
  0xf6   :  { %v126_v9 = vpop.f32.mrb[2].mxu0 }
  0xf7   :  { %v130_v10 = vpack.c.bf16 %v126_v9, %v123_v7  ;;  %v2960_v11 = vpop.f32.mrb[3].mxu0 }
  0xf9   :  { %132 = vrot.lane.b32.xlu0 %v130_v10, %s3354_s18  ;;  %v2646_v10 = vld [vmem:[%s4189_s7] ss:$0 sm:$0xff] }
 0x16b   :  { %v133_v12 = vpop.permute.xlu0 %132 }
 0x16c   :  { %v137_v13 = vsel %vm134_vm3, %v75_v3, %v133_v12 }
 0x16d   :  { %2964 = vmatmul.mubr.msk.bf16.vlgmr.msra.gmra.mrb[0].mxu1 %vm144_vm4, %v137_v13 }
 0x16e   :  { %2981 = vmatprep.mubr.msk.bf16.mxu1 %vm3353_vm0, %v3352_v0  ;;  %2974 = vmatpush3.bf16.msra.mxu1 %v3116_v61  ;;  %v3122_v61 = vld [vmem:[%s4188_s6 + $0x30] sm:$0xff]  }
 0x16f   :  { %2975 = vmatprep.subr.bf16.mxu1 %v3352_v0 }
 0x172   :  { %2976 = vmatpush3.bf16.msra.mxu1 %v3117_v62  ;;  %v3123_v62 = vld [vmem:[%s4188_s6 + $0x38] sm:$0xff]  }
 0x173   :  { %2977 = vmatprep.subr.bf16.mxu1 %v3352_v0 }
 0x176   :  { %2978 = vmatpush3.bf16.msra.mxu1 %v3118_v63 }
 0x177   :  { %2979 = vmatprep.subr.bf16.mxu1 %v3352_v0 }
 0x17a   :  { %2980 = vmatpush3.bf16.msra.mxu1 %v3119_v1 }
 0x17b   :  { %3003 = vmatprep.subr.bf16.mxu1 %v3352_v0 }
 0x240   :  { %v185_v15 = vpop.f32.mrb[0].mxu1 }
 0x241   :  { %v186_v16 = vadd.f32 %v2641_v14, %v185_v15  ;;  %v2965_v17 = vpop.f32.mrb[1].mxu1 }
 0x242   :  { %v188_v18 = vpop.f32.mrb[2].mxu1 }
 0x243   :  { %v192_v19 = vmax.f32 %v186_v16, 0.0  ;;  %v189_v20 = vadd.f32 %v2641_v14, %v188_v18  ;;  %v2966_v21 = vpop.f32.mrb[3].mxu1 }
 0x245   :  { %v206_v22 = vmul.f32 %v192_v19, %v192_v19  ;;  %v193_v23 = vmax.f32 %v189_v20, 0.0  ;;  %v195_v24 = vsel %vm194_vm5, %v192_v19, 0.0 }
 0x247   :  { %v196_v25 = vsel %vm194_vm5, %v193_v23, 0.0  ;;  %v207_v26 = vmul.f32 %v193_v23, %v193_v23  ;;  %v208_v28 = vsel %vm194_vm5, %v206_v22, 0.0 }
 0x248   :  { %v197_v27 = vadd.f32 %v196_v25, %v195_v24 }
 0x249   :  { %v209_v29 = vsel %vm194_vm5, %v207_v26, 0.0 }
 0x24a   :  { %v198_v30 = vrot.slane %v197_v27, 4  ;;  %v210_v31 = vadd.f32 %v209_v29, %v208_v28 }
 0x24c   :  { %v199_v32 = vadd.f32 %v198_v30, %v197_v27  ;;  %v211_v33 = vrot.slane %v210_v31, 4 }
 0x24e   :  { %v200_v34 = vrot.slane %v199_v32, 2  ;;  %v212_v35 = vadd.f32 %v211_v33, %v210_v31 }
 0x250   :  { %v201_v36 = vadd.f32 %v200_v34, %v199_v32  ;;  %v213_v37 = vrot.slane %v212_v35, 2 }
 0x252   :  { %v202_v38 = vrot.slane %v201_v36, 1  ;;  %v214_v39 = vadd.f32 %v213_v37, %v212_v35 }
 0x254   :  { %v203_v40 = vadd.f32 %v202_v38, %v201_v36  ;;  %v215_v41 = vrot.slane %v214_v39, 1 }
 0x256   :  { %v205_v42 = vmul.f32 0.0625, %v203_v40  ;;  %v216_v43 = vadd.f32 %v215_v41, %v214_v39 }
 0x258   :  { %v217_v44 = vmul.f32 0.0625, %v216_v43  ;;  %v218_v45 = vmul.f32 %v205_v42, %v205_v42  ;;  %v221_v46 = vsub.f32 %v192_v19, %v205_v42  ;;  %v222_v47 = vsub.f32 %v193_v23, %v205_v42 }
 0x25a   :  { %v219_v48 = vsub.f32 %v217_v44, %v218_v45 }
 0x25c   :  { %v220_v49 = vmax.f32 %v219_v48, 0.0  ;;  %v2652_v48 = vld [vmem:[%s4190_s8] ss:$0 sm:$0xff] }
 0x25e   :  { %v223_v50 = vadd.f32 1e-05, %v220_v49 }
 0x260   :  { %3308 = vrsqrt.f32 %v223_v50 }
 0x26a   :  { %v3309_v51 = vpop.eup %3308 }
 0x26b   :  { %v226_v53 = vmul.f32 %v3309_v51, %v222_v47  ;;  %v225_v54 = vmul.f32 %v3309_v51, %v221_v46  ;;  %v2653_v51 = vld [vmem:[%s4191_s9] ss:$0 sm:$0xff] }
 0x26d   :  { %v234_v56 = vmul.f32 %v2643_v52, %v226_v53  ;;  %v233_v57 = vmul.f32 %v2643_v52, %v225_v54 }
 0x26f   :  { %v3503_v58 = vadd.f32 %v2644_v55, %v233_v57  ;;  %v3505_v59 = vadd.f32 %v2644_v55, %v234_v56 }
 0x271   :  { %v243_v60 = vpack.c.bf16 %v3505_v59, %v3503_v58 }
 0x273   :  { %2968 = vmatpush3.bf16.msra.mxu0 %v243_v60  ;;  %244 = vst.msk [vmem:[#allocation2] sm:$0xff] %vm194_vm5, %v243_v60 }
 0x274   :  { %2985 = vmatprep.subr.bf16.mxu0 %v3352_v0 }
 0x276   :  { %2970 = vmatmul.mubr.msk.bf16.vlgmr.msra.gmra.mrb[4].mxu0 %vm85_vm1, %v3476_v4 }
 0x277   :  { %2987 = vmatprep.mubr.msk.bf16.mxu0 %vm3353_vm0, %v3352_v0 }
 0x349   :  { %v290_v2 = vpop.f32.mrb[4].mxu0 }
 0x34a   :  { %v2971_v3 = vpop.f32.mrb[5].mxu0 }
 0x34b   :  { %v293_v5 = vpop.f32.mrb[6].mxu0 }
 0x34c   :  { %v297_v6 = vpack.c.bf16 %v293_v5, %v290_v2  ;;  %v2972_v7 = vpop.f32.mrb[7].mxu0 }
 0x34e   :  { %299 = vrot.lane.b32.xlu0 %v297_v6, %s3355_s25 }
 0x3c0   :  { %v300_v8 = vpop.permute.xlu0 %299 }
 0x3c1   :  { %v303_v9 = vsel %vm194_vm5, %v243_v60, %v300_v8  ;;  %v2663_v8 = vld [vmem:[%s4189_s7 + $0x1] ss:$0 sm:$0xff] }
 0x3c2   :  { %2982 = vmatmul.mubr.msk.bf16.vlgmr.msra.gmra.mrb[4].mxu1 %vm332_vm6, %v303_v9 }
 0x3c3   :  { %3005 = vmatprep.mubr.msk.bf16.mxu1 %vm3353_vm0, %v3352_v0 }
 0x495   :  { %v369_v11 = vpop.f32.mrb[4].mxu1 }
 0x496   :  { %v370_v12 = vadd.f32 %v2646_v10, %v369_v11  ;;  %v2983_v13 = vpop.f32.mrb[5].mxu1 }
 0x497   :  { %v372_v14 = vpop.f32.mrb[6].mxu1 }
 0x498   :  { %v376_v15 = vmax.f32 %v370_v12, 0.0  ;;  %v373_v16 = vadd.f32 %v2646_v10, %v372_v14  ;;  %v2984_v17 = vpop.f32.mrb[7].mxu1 }
 0x49a   :  { %v388_v18 = vmul.f32 %v376_v15, %v376_v15  ;;  %v377_v19 = vmax.f32 %v373_v16, 0.0  ;;  %v378_v20 = vsel %vm194_vm5, %v376_v15, 0.0 }
 0x49c   :  { %v379_v21 = vsel %vm194_vm5, %v377_v19, 0.0  ;;  %v389_v22 = vmul.f32 %v377_v19, %v377_v19  ;;  %v390_v24 = vsel %vm194_vm5, %v388_v18, 0.0 }
 0x49d   :  { %v380_v23 = vadd.f32 %v379_v21, %v378_v20 }
 0x49e   :  { %v391_v25 = vsel %vm194_vm5, %v389_v22, 0.0 }
 0x49f   :  { %v381_v26 = vrot.slane %v380_v23, 4  ;;  %v392_v27 = vadd.f32 %v391_v25, %v390_v24 }
 0x4a1   :  { %v382_v28 = vadd.f32 %v381_v26, %v380_v23  ;;  %v393_v29 = vrot.slane %v392_v27, 4 }
 0x4a3   :  { %v383_v30 = vrot.slane %v382_v28, 2  ;;  %v394_v31 = vadd.f32 %v393_v29, %v392_v27 }
 0x4a5   :  { %v384_v32 = vadd.f32 %v383_v30, %v382_v28  ;;  %v395_v33 = vrot.slane %v394_v31, 2 }
 0x4a7   :  { %v385_v34 = vrot.slane %v384_v32, 1  ;;  %v396_v35 = vadd.f32 %v395_v33, %v394_v31 }
 0x4a9   :  { %v386_v36 = vadd.f32 %v385_v34, %v384_v32  ;;  %v397_v37 = vrot.slane %v396_v35, 1 }
 0x4ab   :  { %v387_v38 = vmul.f32 0.0625, %v386_v36  ;;  %v398_v39 = vadd.f32 %v397_v37, %v396_v35 }
 0x4ad   :  { %v399_v40 = vmul.f32 0.0625, %v398_v39  ;;  %v400_v41 = vmul.f32 %v387_v38, %v387_v38  ;;  %v403_v42 = vsub.f32 %v376_v15, %v387_v38  ;;  %v404_v43 = vsub.f32 %v377_v19, %v387_v38 }
 0x4af   :  { %v401_v44 = vsub.f32 %v399_v40, %v400_v41 }
 0x4b1   :  { %v402_v45 = vmax.f32 %v401_v44, 0.0 }
 0x4b3   :  { %v405_v46 = vadd.f32 1e-05, %v402_v45 }
 0x4b5   :  { %3310 = vrsqrt.f32 %v405_v46  ;;  %v2669_v46 = vld [vmem:[%s4190_s8 + $0x1] ss:$0 sm:$0xff] }
 0x4bf   :  { %v3311_v47 = vpop.eup %3310 }
 0x4c0   :  { %v407_v49 = vmul.f32 %v3311_v47, %v403_v42  ;;  %v408_v50 = vmul.f32 %v3311_v47, %v404_v43 }
 0x4c2   :  { %v413_v52 = vmul.f32 %v2652_v48, %v407_v49  ;;  %v414_v53 = vmul.f32 %v2652_v48, %v408_v50  ;;  %v2670_v49 = vld [vmem:[%s4191_s9 + $0x1] ss:$0 sm:$0xff] }
 0x4c4   :  { %v419_v54 = vadd.f32 %v2653_v51, %v413_v52  ;;  %v420_v55 = vadd.f32 %v2653_v51, %v414_v53 }
 0x4c6   :  { %v3550_v56 = vadd.f32 %v419_v54, %v3503_v58  ;;  %v3553_v57 = vadd.f32 %v420_v55, %v3505_v59  ;;  %v3120_v58 = vld [vmem:[%s4188_s6 + $0x20] sm:$0xff]   ;;  %v3121_v59 = vld [vmem:[%s4188_s6 + $0x28] sm:$0xff]  }
 0x4c8   :  { %v3557_v60 = vpack.c.bf16 %v3553_v57, %v3550_v56 }
 0x4ca   :  { %2986 = vmatpush3.bf16.msra.mxu0 %v3557_v60 }
 0x4cb   :  { %2991 = vmatprep.subr.bf16.mxu0 %v3352_v0 }
 0x4cd   :  { %2988 = vmatmul.mubr.msk.bf16.vlgmr.msra.gmra.mrb[8].mxu0 %vm85_vm1, %v3476_v4 }
 0x4ce   :  { %2999 = vmatprep.mubr.msk.bf16.mxu0 %vm3353_vm0, %v3352_v0  ;;  %2992 = vmatpush3.bf16.msra.mxu0 %v3120_v58 }
 0x4cf   :  { %2993 = vmatprep.subr.bf16.mxu0 %v3352_v0 }
 0x4d2   :  { %2994 = vmatpush3.bf16.msra.mxu0 %v3121_v59  ;;  %v3126_v59 = vld [vmem:[%s4188_s6 + $0x50] sm:$0xff]  }
 0x4d3   :  { %2995 = vmatprep.subr.bf16.mxu0 %v3352_v0 }
 0x4d6   :  { %2996 = vmatpush3.bf16.msra.mxu0 %v3122_v61  ;;  %v3127_v61 = vld [vmem:[%s4188_s6 + $0x58] sm:$0xff]  }
 0x4d7   :  { %2997 = vmatprep.subr.bf16.mxu0 %v3352_v0 }
 0x4da   :  { %2998 = vmatpush3.bf16.msra.mxu0 %v3123_v62 }
 0x4db   :  { %3021 = vmatprep.subr.bf16.mxu0 %v3352_v0 }
 0x5a0   :  { %v476_v63 = vpop.f32.mrb[8].mxu0 }
 0x5a1   :  { %v2989_v1 = vpop.f32.mrb[9].mxu0 }
 0x5a2   :  { %v479_v2 = vpop.f32.mrb[10].mxu0 }
 0x5a3   :  { %v483_v3 = vpack.c.bf16 %v479_v2, %v476_v63  ;;  %v2990_v5 = vpop.f32.mrb[11].mxu0 }
 0x5a5   :  { %485 = vrot.lane.b32.xlu1 %v483_v3, %s3355_s25 }
 0x617   :  { %v486_v6 = vpop.permute.xlu1 %485 }
 0x618   :  { %v489_v7 = vsel %vm194_vm5, %v3557_v60, %v486_v6 }
 0x619   :  { %3000 = vmatmul.mubr.msk.bf16.vlgmr.msra.gmra.mrb[12].mxu0 %vm332_vm6, %v489_v7  ;;  %v2680_v7 = vld [vmem:[%s4189_s7 + $0x2] ss:$0 sm:$0xff] }
 0x61a   :  { %3023 = vmatprep.mubr.msk.bf16.mxu0 %vm3353_vm0, %v3352_v0 }
 0x6ec   :  { %v554_v9 = vpop.f32.mrb[12].mxu0 }
 0x6ed   :  { %v555_v10 = vadd.f32 %v2663_v8, %v554_v9  ;;  %v3001_v11 = vpop.f32.mrb[13].mxu0 }
 0x6ee   :  { %v557_v12 = vpop.f32.mrb[14].mxu0 }
 0x6ef   :  { %v561_v13 = vmax.f32 %v555_v10, 0.0  ;;  %v558_v14 = vadd.f32 %v2663_v8, %v557_v12  ;;  %v3002_v15 = vpop.f32.mrb[15].mxu0 }
 0x6f1   :  { %v573_v16 = vmul.f32 %v561_v13, %v561_v13  ;;  %v562_v17 = vmax.f32 %v558_v14, 0.0  ;;  %v563_v18 = vsel %vm194_vm5, %v561_v13, 0.0 }
 0x6f3   :  { %v564_v19 = vsel %vm194_vm5, %v562_v17, 0.0  ;;  %v574_v20 = vmul.f32 %v562_v17, %v562_v17  ;;  %v575_v22 = vsel %vm194_vm5, %v573_v16, 0.0 }
 0x6f4   :  { %v565_v21 = vadd.f32 %v564_v19, %v563_v18 }
 0x6f5   :  { %v576_v23 = vsel %vm194_vm5, %v574_v20, 0.0 }
 0x6f6   :  { %v566_v24 = vrot.slane %v565_v21, 4  ;;  %v577_v25 = vadd.f32 %v576_v23, %v575_v22 }
 0x6f8   :  { %v567_v26 = vadd.f32 %v566_v24, %v565_v21  ;;  %v578_v27 = vrot.slane %v577_v25, 4 }
 0x6fa   :  { %v568_v28 = vrot.slane %v567_v26, 2  ;;  %v579_v29 = vadd.f32 %v578_v27, %v577_v25 }
 0x6fc   :  { %v569_v30 = vadd.f32 %v568_v28, %v567_v26  ;;  %v580_v31 = vrot.slane %v579_v29, 2 }
 0x6fe   :  { %v570_v32 = vrot.slane %v569_v30, 1  ;;  %v581_v33 = vadd.f32 %v580_v31, %v579_v29 }
 0x700   :  { %v571_v34 = vadd.f32 %v570_v32, %v569_v30  ;;  %v582_v35 = vrot.slane %v581_v33, 1 }
 0x702   :  { %v572_v36 = vmul.f32 0.0625, %v571_v34  ;;  %v583_v37 = vadd.f32 %v582_v35, %v581_v33 }
 0x704   :  { %v584_v38 = vmul.f32 0.0625, %v583_v37  ;;  %v585_v39 = vmul.f32 %v572_v36, %v572_v36  ;;  %v588_v40 = vsub.f32 %v561_v13, %v572_v36  ;;  %v589_v41 = vsub.f32 %v562_v17, %v572_v36 }
 0x706   :  { %v586_v42 = vsub.f32 %v584_v38, %v585_v39 }
 0x708   :  { %v587_v43 = vmax.f32 %v586_v42, 0.0 }
 0x70a   :  { %v590_v44 = vadd.f32 1e-05, %v587_v43 }
 0x70c   :  { %3312 = vrsqrt.f32 %v590_v44 }
 0x716   :  { %v3313_v45 = vpop.eup %3312 }
 0x717   :  { %v592_v47 = vmul.f32 %v3313_v45, %v588_v40  ;;  %v593_v48 = vmul.f32 %v3313_v45, %v589_v41  ;;  %v2686_v45 = vld [vmem:[%s4190_s8 + $0x2] ss:$0 sm:$0xff] }
 0x719   :  { %v598_v50 = vmul.f32 %v2669_v46, %v592_v47  ;;  %v599_v51 = vmul.f32 %v2669_v46, %v593_v48  ;;  %v2687_v48 = vld [vmem:[%s4191_s9 + $0x2] ss:$0 sm:$0xff] }
 0x71b   :  { %v604_v52 = vadd.f32 %v2670_v49, %v598_v50  ;;  %v605_v53 = vadd.f32 %v2670_v49, %v599_v51 }
 0x71d   :  { %v3601_v54 = vadd.f32 %v604_v52, %v3550_v56  ;;  %v3604_v55 = vadd.f32 %v605_v53, %v3553_v57  ;;  %v3124_v56 = vld [vmem:[%s4188_s6 + $0x40] sm:$0xff]   ;;  %v3125_v57 = vld [vmem:[%s4188_s6 + $0x48] sm:$0xff]  }
 0x71f   :  { %v3608_v58 = vpack.c.bf16 %v3604_v55, %v3601_v54 }
 0x721   :  { %3004 = vmatpush3.bf16.msra.mxu1 %v3608_v58 }
 0x722   :  { %3009 = vmatprep.subr.bf16.mxu1 %v3352_v0 }
 0x724   :  { %3006 = vmatmul.mubr.msk.bf16.vlgmr.msra.gmra.mrb[8].mxu1 %vm85_vm1, %v3476_v4 }
 0x725   :  { %3017 = vmatprep.mubr.msk.bf16.mxu1 %vm3353_vm0, %v3352_v0  ;;  %3010 = vmatpush3.bf16.msra.mxu1 %v3124_v56 }
 0x726   :  { %3011 = vmatprep.subr.bf16.mxu1 %v3352_v0 }
 0x729   :  { %3012 = vmatpush3.bf16.msra.mxu1 %v3125_v57 }
 0x72a   :  { %3013 = vmatprep.subr.bf16.mxu1 %v3352_v0 }
 0x72d   :  { %3014 = vmatpush3.bf16.msra.mxu1 %v3126_v59  ;;  %v3130_v59 = vld [vmem:[%s4188_s6 + $0x70] sm:$0xff]  }
 0x72e   :  { %3015 = vmatprep.subr.bf16.mxu1 %v3352_v0 }
 0x731   :  { %3016 = vmatpush3.bf16.msra.mxu1 %v3127_v61 }
 0x732   :  { %3039 = vmatprep.subr.bf16.mxu1 %v3352_v0 }
 0x7f7   :  { %v661_v62 = vpop.f32.mrb[8].mxu1 }
 0x7f8   :  { %v3007_v63 = vpop.f32.mrb[9].mxu1 }
 0x7f9   :  { %v664_v1 = vpop.f32.mrb[10].mxu1 }
 0x7fa   :  { %v668_v2 = vpack.c.bf16 %v664_v1, %v661_v62  ;;  %v3008_v3 = vpop.f32.mrb[11].mxu1 }
 0x7fc   :  { %670 = vrot.lane.b32.xlu1 %v668_v2, %s3355_s25 }
 0x86e   :  { %v671_v5 = vpop.permute.xlu1 %670 }
 0x86f   :  { %v674_v6 = vsel %vm194_vm5, %v3608_v58, %v671_v5 }
 0x870   :  { %3018 = vmatmul.mubr.msk.bf16.vlgmr.msra.gmra.mrb[12].mxu1 %vm332_vm6, %v674_v6  ;;  %v2697_v6 = vld [vmem:[%s4189_s7 + $0x3] ss:$0 sm:$0xff] }
 0x871   :  { %3041 = vmatprep.mubr.msk.bf16.mxu1 %vm3353_vm0, %v3352_v0 }
 0x943   :  { %v739_v8 = vpop.f32.mrb[12].mxu1 }
 0x944   :  { %v740_v9 = vadd.f32 %v2680_v7, %v739_v8  ;;  %v3019_v10 = vpop.f32.mrb[13].mxu1 }
 0x945   :  { %v742_v11 = vpop.f32.mrb[14].mxu1 }
 0x946   :  { %v746_v12 = vmax.f32 %v740_v9, 0.0  ;;  %v743_v13 = vadd.f32 %v2680_v7, %v742_v11  ;;  %v3020_v14 = vpop.f32.mrb[15].mxu1 }
 0x948   :  { %v758_v15 = vmul.f32 %v746_v12, %v746_v12  ;;  %v747_v16 = vmax.f32 %v743_v13, 0.0  ;;  %v748_v17 = vsel %vm194_vm5, %v746_v12, 0.0 }
 0x94a   :  { %v749_v18 = vsel %vm194_vm5, %v747_v16, 0.0  ;;  %v759_v19 = vmul.f32 %v747_v16, %v747_v16  ;;  %v760_v21 = vsel %vm194_vm5, %v758_v15, 0.0 }
 0x94b   :  { %v750_v20 = vadd.f32 %v749_v18, %v748_v17 }
 0x94c   :  { %v761_v22 = vsel %vm194_vm5, %v759_v19, 0.0 }
 0x94d   :  { %v751_v23 = vrot.slane %v750_v20, 4  ;;  %v762_v24 = vadd.f32 %v761_v22, %v760_v21 }
 0x94f   :  { %v752_v25 = vadd.f32 %v751_v23, %v750_v20  ;;  %v763_v26 = vrot.slane %v762_v24, 4 }
 0x951   :  { %v753_v27 = vrot.slane %v752_v25, 2  ;;  %v764_v28 = vadd.f32 %v763_v26, %v762_v24 }
 0x953   :  { %v754_v29 = vadd.f32 %v753_v27, %v752_v25  ;;  %v765_v30 = vrot.slane %v764_v28, 2 }
 0x955   :  { %v755_v31 = vrot.slane %v754_v29, 1  ;;  %v766_v32 = vadd.f32 %v765_v30, %v764_v28 }
 0x957   :  { %v756_v33 = vadd.f32 %v755_v31, %v754_v29  ;;  %v767_v34 = vrot.slane %v766_v32, 1 }
 0x959   :  { %v757_v35 = vmul.f32 0.0625, %v756_v33  ;;  %v768_v36 = vadd.f32 %v767_v34, %v766_v32 }
 0x95b   :  { %v769_v37 = vmul.f32 0.0625, %v768_v36  ;;  %v770_v38 = vmul.f32 %v757_v35, %v757_v35  ;;  %v773_v39 = vsub.f32 %v746_v12, %v757_v35  ;;  %v774_v40 = vsub.f32 %v747_v16, %v757_v35 }
 0x95d   :  { %v771_v41 = vsub.f32 %v769_v37, %v770_v38 }
 0x95f   :  { %v772_v42 = vmax.f32 %v771_v41, 0.0 }
 0x961   :  { %v775_v43 = vadd.f32 1e-05, %v772_v42 }
 0x963   :  { %3314 = vrsqrt.f32 %v775_v43 }
 0x96d   :  { %v3315_v44 = vpop.eup %3314 }
 0x96e   :  { %v777_v46 = vmul.f32 %v3315_v44, %v773_v39  ;;  %v778_v47 = vmul.f32 %v3315_v44, %v774_v40  ;;  %v2703_v44 = vld [vmem:[%s4190_s8 + $0x3] ss:$0 sm:$0xff] }
 0x970   :  { %v783_v49 = vmul.f32 %v2686_v45, %v777_v46  ;;  %v784_v50 = vmul.f32 %v2686_v45, %v778_v47  ;;  %v2704_v47 = vld [vmem:[%s4191_s9 + $0x3] ss:$0 sm:$0xff] }
 0x972   :  { %v789_v51 = vadd.f32 %v2687_v48, %v783_v49  ;;  %v790_v52 = vadd.f32 %v2687_v48, %v784_v50 }
 0x974   :  { %v3652_v53 = vadd.f32 %v789_v51, %v3601_v54  ;;  %v3655_v56 = vadd.f32 %v790_v52, %v3604_v55  ;;  %v3128_v54 = vld [vmem:[%s4188_s6 + $0x60] sm:$0xff]   ;;  %v3129_v55 = vld [vmem:[%s4188_s6 + $0x68] sm:$0xff]  }
 0x976   :  { %v3659_v57 = vpack.c.bf16 %v3655_v56, %v3652_v53 }
 0x978   :  { %3022 = vmatpush3.bf16.msra.mxu0 %v3659_v57 }
 0x979   :  { %3027 = vmatprep.subr.bf16.mxu0 %v3352_v0 }
 0x97b   :  { %3024 = vmatmul.mubr.msk.bf16.vlgmr.msra.gmra.mrb[16].mxu0 %vm85_vm1, %v3476_v4  ;;  %v3131_v4 = vld [vmem:[%s4188_s6 + $0x78] sm:$0xff]  }
 0x97c   :  { %3035 = vmatprep.mubr.msk.bf16.mxu0 %vm3353_vm0, %v3352_v0  ;;  %3028 = vmatpush3.bf16.msra.mxu0 %v3128_v54 }
 0x97d   :  { %3029 = vmatprep.subr.bf16.mxu0 %v3352_v0 }
 0x980   :  { %3030 = vmatpush3.bf16.msra.mxu0 %v3129_v55 }
 0x981   :  { %3031 = vmatprep.subr.bf16.mxu0 %v3352_v0 }
 0x984   :  { %3032 = vmatpush3.bf16.msra.mxu0 %v3130_v59  ;;  %v3715_v59 = vld [vmem:[%s4205_s29] sm:$0xff]  }
 0x985   :  { %3033 = vmatprep.subr.bf16.mxu0 %v3352_v0 }
 0x988   :  { %3034 = vmatpush3.bf16.msra.mxu0 %v3131_v4  ;;  %v3134_v4 = vld [vmem:[%s4188_s6 + $0x90] sm:$0xff]  }
 0x989   :  { %3057 = vmatprep.subr.bf16.mxu0 %v3352_v0 }
 0xa4e   :  { %v846_v61 = vpop.f32.mrb[16].mxu0 }
 0xa4f   :  { %v3025_v62 = vpop.f32.mrb[17].mxu0 }
 0xa50   :  { %v849_v63 = vpop.f32.mrb[18].mxu0 }
 0xa51   :  { %v853_v1 = vpack.c.bf16 %v849_v63, %v846_v61  ;;  %v3026_v2 = vpop.f32.mrb[19].mxu0  ;;  %v3135_v61 = vld [vmem:[%s4188_s6 + $0x98] sm:$0xff]  }
 0xa53   :  { %855 = vrot.lane.b32.xlu0 %v853_v1, %s3355_s25 }
 0xac5   :  { %v856_v3 = vpop.permute.xlu0 %855 }
 0xac6   :  { %v859_v5 = vsel %vm194_vm5, %v3659_v57, %v856_v3 }
 0xac7   :  { %3036 = vmatmul.mubr.msk.bf16.vlgmr.msra.gmra.mrb[20].mxu0 %vm332_vm6, %v859_v5 }
 0xac8   :  { %3059 = vmatprep.mubr.msk.bf16.mxu0 %vm3353_vm0, %v3352_v0 }
 0xb9a   :  { %v924_v7 = vpop.f32.mrb[20].mxu0 }
 0xb9b   :  { %v925_v8 = vadd.f32 %v2697_v6, %v924_v7  ;;  %v3037_v9 = vpop.f32.mrb[21].mxu0  ;;  %v2714_v7 = vld [vmem:[%s4189_s7 + $0x4] ss:$0 sm:$0xff] }
 0xb9c   :  { %v927_v10 = vpop.f32.mrb[22].mxu0 }
 0xb9d   :  { %v931_v11 = vmax.f32 %v925_v8, 0.0  ;;  %v928_v12 = vadd.f32 %v2697_v6, %v927_v10  ;;  %v3038_v13 = vpop.f32.mrb[23].mxu0 }
 0xb9f   :  { %v943_v14 = vmul.f32 %v931_v11, %v931_v11  ;;  %v932_v15 = vmax.f32 %v928_v12, 0.0  ;;  %v933_v16 = vsel %vm194_vm5, %v931_v11, 0.0 }
 0xba1   :  { %v934_v17 = vsel %vm194_vm5, %v932_v15, 0.0  ;;  %v944_v18 = vmul.f32 %v932_v15, %v932_v15  ;;  %v945_v20 = vsel %vm194_vm5, %v943_v14, 0.0 }
 0xba2   :  { %v935_v19 = vadd.f32 %v934_v17, %v933_v16 }
 0xba3   :  { %v946_v21 = vsel %vm194_vm5, %v944_v18, 0.0 }
 0xba4   :  { %v936_v22 = vrot.slane %v935_v19, 4  ;;  %v947_v23 = vadd.f32 %v946_v21, %v945_v20 }
 0xba6   :  { %v937_v24 = vadd.f32 %v936_v22, %v935_v19  ;;  %v948_v25 = vrot.slane %v947_v23, 4 }
 0xba8   :  { %v938_v26 = vrot.slane %v937_v24, 2  ;;  %v949_v27 = vadd.f32 %v948_v25, %v947_v23 }
 0xbaa   :  { %v939_v28 = vadd.f32 %v938_v26, %v937_v24  ;;  %v950_v29 = vrot.slane %v949_v27, 2 }
 0xbac   :  { %v940_v30 = vrot.slane %v939_v28, 1  ;;  %v951_v31 = vadd.f32 %v950_v29, %v949_v27 }
 0xbae   :  { %v941_v32 = vadd.f32 %v940_v30, %v939_v28  ;;  %v952_v33 = vrot.slane %v951_v31, 1 }
 0xbb0   :  { %v942_v34 = vmul.f32 0.0625, %v941_v32  ;;  %v953_v35 = vadd.f32 %v952_v33, %v951_v31 }
 0xbb2   :  { %v954_v36 = vmul.f32 0.0625, %v953_v35  ;;  %v955_v37 = vmul.f32 %v942_v34, %v942_v34  ;;  %v958_v38 = vsub.f32 %v931_v11, %v942_v34  ;;  %v959_v39 = vsub.f32 %v932_v15, %v942_v34 }
 0xbb4   :  { %v956_v40 = vsub.f32 %v954_v36, %v955_v37 }
 0xbb6   :  { %v957_v41 = vmax.f32 %v956_v40, 0.0 }
 0xbb8   :  { %v960_v42 = vadd.f32 1e-05, %v957_v41 }
 0xbba   :  { %3316 = vrsqrt.f32 %v960_v42 }
 0xbc4   :  { %v3317_v43 = vpop.eup %3316 }
 0xbc5   :  { %v962_v45 = vmul.f32 %v3317_v43, %v958_v38  ;;  %v963_v46 = vmul.f32 %v3317_v43, %v959_v39 }
 0xbc7   :  { %v968_v48 = vmul.f32 %v2703_v44, %v962_v45  ;;  %v969_v49 = vmul.f32 %v2703_v44, %v963_v46  ;;  %v2720_v45 = vld [vmem:[%s4190_s8 + $0x4] ss:$0 sm:$0xff] }
 0xbc9   :  { %v974_v50 = vadd.f32 %v2704_v47, %v968_v48  ;;  %v975_v51 = vadd.f32 %v2704_v47, %v969_v49  ;;  %v2721_v48 = vld [vmem:[%s4191_s9 + $0x4] ss:$0 sm:$0xff] }
 0xbcb   :  { %v3703_v52 = vadd.f32 %v974_v50, %v3652_v53  ;;  %v3706_v54 = vadd.f32 %v975_v51, %v3655_v56  ;;  %v3132_v53 = vld [vmem:[%s4188_s6 + $0x80] sm:$0xff]   ;;  %v3133_v56 = vld [vmem:[%s4188_s6 + $0x88] sm:$0xff]  }
 0xbcd   :  { %v978_v55 = vpack.c.bf16 %v3706_v54, %v3703_v52 }
 0xbcf   :  { %3040 = vmatpush3.bf16.msra.mxu1 %v978_v55  ;;  %979 = vst.msk [vmem:[#allocation2 + $0x8] sm:$0xff] %vm194_vm5, %v978_v55 }
 0xbd0   :  { %3045 = vmatprep.subr.bf16.mxu1 %v3352_v0 }
 0xbd2   :  { %3042 = vmatmul.mubr.msk.bf16.vlgmr.msra.gmra.mrb[16].mxu1 %vm85_vm1, %v3715_v59 }
 0xbd3   :  { %3053 = vmatprep.mubr.msk.bf16.mxu1 %vm3353_vm0, %v3352_v0  ;;  %3046 = vmatpush3.bf16.msra.mxu1 %v3132_v53 }
 0xbd4   :  { %3047 = vmatprep.subr.bf16.mxu1 %v3352_v0 }
 0xbd7   :  { %3048 = vmatpush3.bf16.msra.mxu1 %v3133_v56 }
 0xbd8   :  { %3049 = vmatprep.subr.bf16.mxu1 %v3352_v0 }
 0xbdb   :  { %3050 = vmatpush3.bf16.msra.mxu1 %v3134_v4 }
 0xbdc   :  { %3051 = vmatprep.subr.bf16.mxu1 %v3352_v0 }
 0xbdf   :  { %3052 = vmatpush3.bf16.msra.mxu1 %v3135_v61  ;;  %v3138_v61 = vld [vmem:[%s4188_s6 + $0xb0] sm:$0xff]  }
 0xbe0   :  { %3075 = vmatprep.subr.bf16.mxu1 %v3352_v0 }
 0xca5   :  { %v1026_v62 = vpop.f32.mrb[16].mxu1 }
 0xca6   :  { %v3043_v63 = vpop.f32.mrb[17].mxu1 }
 0xca7   :  { %v1029_v1 = vpop.f32.mrb[18].mxu1 }
 0xca8   :  { %v1033_v2 = vpack.c.bf16 %v1029_v1, %v1026_v62  ;;  %v3044_v3 = vpop.f32.mrb[19].mxu1  ;;  %v3139_v62 = vld [vmem:[%s4188_s6 + $0xb8] sm:$0xff]  }
 0xcaa   :  { %1035 = vrot.lane.b32.xlu1 %v1033_v2, %s3355_s25 }
 0xd1c   :  { %v1036_v5 = vpop.permute.xlu1 %1035 }
 0xd1d   :  { %v1039_v6 = vsel %vm194_vm5, %v978_v55, %v1036_v5 }
 0xd1e   :  { %3054 = vmatmul.mubr.msk.bf16.vlgmr.msra.gmra.mrb[20].mxu1 %vm332_vm6, %v1039_v6 }
 0xd1f   :  { %3077 = vmatprep.mubr.msk.bf16.mxu1 %vm3353_vm0, %v3352_v0 }
 0xdf1   :  { %v1104_v8 = vpop.f32.mrb[20].mxu1 }
 0xdf2   :  { %v1105_v9 = vadd.f32 %v2714_v7, %v1104_v8  ;;  %v3055_v10 = vpop.f32.mrb[21].mxu1 }
 0xdf3   :  { %v1107_v11 = vpop.f32.mrb[22].mxu1 }
 0xdf4   :  { %v1111_v12 = vmax.f32 %v1105_v9, 0.0  ;;  %v1108_v13 = vadd.f32 %v2714_v7, %v1107_v11  ;;  %v3056_v14 = vpop.f32.mrb[23].mxu1  ;;  %v2731_v9 = vld [vmem:[%s4189_s7 + $0x5] ss:$0 sm:$0xff] }
 0xdf6   :  { %v1123_v15 = vmul.f32 %v1111_v12, %v1111_v12  ;;  %v1112_v16 = vmax.f32 %v1108_v13, 0.0  ;;  %v1113_v17 = vsel %vm194_vm5, %v1111_v12, 0.0 }
 0xdf8   :  { %v1114_v18 = vsel %vm194_vm5, %v1112_v16, 0.0  ;;  %v1124_v19 = vmul.f32 %v1112_v16, %v1112_v16  ;;  %v1125_v21 = vsel %vm194_vm5, %v1123_v15, 0.0 }
 0xdf9   :  { %v1115_v20 = vadd.f32 %v1114_v18, %v1113_v17 }
 0xdfa   :  { %v1126_v22 = vsel %vm194_vm5, %v1124_v19, 0.0 }
 0xdfb   :  { %v1116_v23 = vrot.slane %v1115_v20, 4  ;;  %v1127_v24 = vadd.f32 %v1126_v22, %v1125_v21 }
 0xdfd   :  { %v1117_v25 = vadd.f32 %v1116_v23, %v1115_v20  ;;  %v1128_v26 = vrot.slane %v1127_v24, 4 }
 0xdff   :  { %v1118_v27 = vrot.slane %v1117_v25, 2  ;;  %v1129_v28 = vadd.f32 %v1128_v26, %v1127_v24 }
 0xe01   :  { %v1119_v29 = vadd.f32 %v1118_v27, %v1117_v25  ;;  %v1130_v30 = vrot.slane %v1129_v28, 2 }
 0xe03   :  { %v1120_v31 = vrot.slane %v1119_v29, 1  ;;  %v1131_v32 = vadd.f32 %v1130_v30, %v1129_v28 }
 0xe05   :  { %v1121_v33 = vadd.f32 %v1120_v31, %v1119_v29  ;;  %v1132_v34 = vrot.slane %v1131_v32, 1 }
 0xe07   :  { %v1122_v35 = vmul.f32 0.0625, %v1121_v33  ;;  %v1133_v36 = vadd.f32 %v1132_v34, %v1131_v32 }
 0xe09   :  { %v1134_v37 = vmul.f32 0.0625, %v1133_v36  ;;  %v1135_v38 = vmul.f32 %v1122_v35, %v1122_v35  ;;  %v1138_v39 = vsub.f32 %v1111_v12, %v1122_v35  ;;  %v1139_v40 = vsub.f32 %v1112_v16, %v1122_v35 }
 0xe0b   :  { %v1136_v41 = vsub.f32 %v1134_v37, %v1135_v38 }
 0xe0d   :  { %v1137_v42 = vmax.f32 %v1136_v41, 0.0 }
 0xe0f   :  { %v1140_v43 = vadd.f32 1e-05, %v1137_v42 }
 0xe11   :  { %3318 = vrsqrt.f32 %v1140_v43 }
 0xe1b   :  { %v3319_v44 = vpop.eup %3318 }
 0xe1c   :  { %v1142_v46 = vmul.f32 %v3319_v44, %v1138_v39  ;;  %v1143_v47 = vmul.f32 %v3319_v44, %v1139_v40 }
 0xe1e   :  { %v1148_v49 = vmul.f32 %v2720_v45, %v1142_v46  ;;  %v1149_v50 = vmul.f32 %v2720_v45, %v1143_v47  ;;  %v2737_v47 = vld [vmem:[%s4190_s8 + $0x5] ss:$0 sm:$0xff] }
 0xe20   :  { %v1154_v51 = vadd.f32 %v2721_v48, %v1148_v49  ;;  %v1155_v55 = vadd.f32 %v2721_v48, %v1149_v50  ;;  %v2738_v50 = vld [vmem:[%s4191_s9 + $0x5] ss:$0 sm:$0xff] }
 0xe22   :  { %v3756_v53 = vadd.f32 %v1154_v51, %v3703_v52  ;;  %v3759_v56 = vadd.f32 %v1155_v55, %v3706_v54  ;;  %v3136_v52 = vld [vmem:[%s4188_s6 + $0xa0] sm:$0xff]   ;;  %v3137_v54 = vld [vmem:[%s4188_s6 + $0xa8] sm:$0xff]  }
 0xe24   :  { %v1158_v4 = vpack.c.bf16 %v3759_v56, %v3756_v53 }
 0xe26   :  { %3058 = vmatpush3.bf16.msra.mxu0 %v1158_v4 }
 0xe27   :  { %3063 = vmatprep.subr.bf16.mxu0 %v3352_v0 }
 0xe29   :  { %3060 = vmatmul.mubr.msk.bf16.vlgmr.msra.gmra.mrb[24].mxu0 %vm85_vm1, %v3715_v59 }
 0xe2a   :  { %3071 = vmatprep.mubr.msk.bf16.mxu0 %vm3353_vm0, %v3352_v0  ;;  %3064 = vmatpush3.bf16.msra.mxu0 %v3136_v52 }
 0xe2b   :  { %3065 = vmatprep.subr.bf16.mxu0 %v3352_v0 }
 0xe2e   :  { %3066 = vmatpush3.bf16.msra.mxu0 %v3137_v54 }
 0xe2f   :  { %3067 = vmatprep.subr.bf16.mxu0 %v3352_v0 }
 0xe32   :  { %3068 = vmatpush3.bf16.msra.mxu0 %v3138_v61 }
 0xe33   :  { %3069 = vmatprep.subr.bf16.mxu0 %v3352_v0 }
 0xe36   :  { %3070 = vmatpush3.bf16.msra.mxu0 %v3139_v62 }
 0xefc   :  { %v1210_v63 = vpop.f32.mrb[24].mxu0 }
 0xefd   :  { %v3061_v1 = vpop.f32.mrb[25].mxu0 }
 0xefe   :  { %v1213_v2 = vpop.f32.mrb[26].mxu0 }
 0xeff   :  { %v1217_v3 = vpack.c.bf16 %v1213_v2, %v1210_v63  ;;  %v3062_v5 = vpop.f32.mrb[27].mxu0  ;;  %v3142_v63 = vld [vmem:[%s4188_s6 + $0xd0] sm:$0xff]  }
 0xf01   :  { %1219 = vrot.lane.b32.xlu0 %v1217_v3, %s3355_s25 }
 0xf05   :  { %1160 = vrot.lane.b32.xlu0 %v1158_v4, %s3355_s25 }
 0xf73   :  { %v1220_v6 = vpop.permute.xlu0 %1219 }
 0xf74   :  { %v1223_v7 = vsel %vm194_vm5, %v1158_v4, %v1220_v6 }
 0xf75   :  { %3072 = vmatmul.mubr.msk.bf16.vlgmr.msra.gmra.mrb[28].mxu0 %vm332_vm6, %v1223_v7 }
 0xf77   :  { %v1161_v8 = vpop.permute.xlu0 %1160 }
 0xf78   :  { %1163 = vst.msk [vmem:[#allocation2 + $0x8] sm:$0xff] %vm428_vm7, %v1161_v8 }
0x1048   :  { %v1288_v10 = vpop.f32.mrb[28].mxu0 }
0x1049   :  { %v1289_v11 = vadd.f32 %v2731_v9, %v1288_v10  ;;  %v3073_v12 = vpop.f32.mrb[29].mxu0 }
0x104a   :  { %v1291_v13 = vpop.f32.mrb[30].mxu0 }
0x104b   :  { %v1295_v14 = vmax.f32 %v1289_v11, 0.0  ;;  %v1292_v15 = vadd.f32 %v2731_v9, %v1291_v13  ;;  %v3074_v16 = vpop.f32.mrb[31].mxu0  ;;  %v3149_v13 = vld [vmem:[%s4192_s10 + $0xc] ss:$16 sps:$4 sm:$0xff]  }
0x104c   :  { %v3150_v16 = vld [vmem:[%s4192_s10 + $0x20] ss:$16 sps:$4 sm:$0xff]  }
0x104d   :  { %v1307_v17 = vmul.f32 %v1295_v14, %v1295_v14  ;;  %v1296_v18 = vmax.f32 %v1292_v15, 0.0  ;;  %v1297_v19 = vsel %vm194_vm5, %v1295_v14, 0.0  ;;  %v3155_v15 = vld [vmem:[%s4192_s10 + $0x2c] ss:$16 sps:$4 sm:$0xff]  }
0x104f   :  { %v1298_v20 = vsel %vm194_vm5, %v1296_v18, 0.0  ;;  %v1308_v21 = vmul.f32 %v1296_v18, %v1296_v18  ;;  %v1309_v23 = vsel %vm194_vm5, %v1307_v17, 0.0  ;;  %v3153_v17 = vld [vmem:[%s4192_s10 + $0x28] ss:$16 sps:$4 sm:$0xff]  }
0x1050   :  { %v1299_v22 = vadd.f32 %v1298_v20, %v1297_v19  ;;  %v3161_v19 = vld [vmem:[%s4192_s10 + $0x4c] ss:$16 sps:$4 sm:$0xff]   ;;  %v3156_v20 = vld [vmem:[%s4192_s10 + $0x40] ss:$16 sps:$4 sm:$0xff]  }
0x1051   :  { %v1310_v24 = vsel %vm194_vm5, %v1308_v21, 0.0  ;;  %v3159_v21 = vld [vmem:[%s4192_s10 + $0x48] ss:$16 sps:$4 sm:$0xff]  }
0x1052   :  { %v1300_v25 = vrot.slane %v1299_v22, 4  ;;  %v1311_v26 = vadd.f32 %v1310_v24, %v1309_v23  ;;  %v3167_v23 = vld [vmem:[%s4192_s10 + $0x6c] ss:$16 sps:$4 sm:$0xff]   ;;  %v3162_v24 = vld [vmem:[%s4192_s10 + $0x60] ss:$16 sps:$4 sm:$0xff]  }
0x1054   :  { %v1301_v27 = vadd.f32 %v1300_v25, %v1299_v22  ;;  %v1312_v28 = vrot.slane %v1311_v26, 4  ;;  %v3164_v22 = vld [vmem:[%s4192_s10 + $0x64] ss:$16 sps:$4 sm:$0xff]   ;;  %v3165_v25 = vld [vmem:[%s4192_s10 + $0x68] ss:$16 sps:$4 sm:$0xff]  }
0x1056   :  { %v1302_v29 = vrot.slane %v1301_v27, 2  ;;  %v1313_v30 = vadd.f32 %v1312_v28, %v1311_v26  ;;  %v3170_v26 = vld [vmem:[%s4192_s10 + $0x84] ss:$16 sps:$4 sm:$0xff]   ;;  %v3168_v28 = vld [vmem:[%s4192_s10 + $0x80] ss:$16 sps:$4 sm:$0xff]  }
0x1058   :  { %v1303_v31 = vadd.f32 %v1302_v29, %v1301_v27  ;;  %v1314_v32 = vrot.slane %v1313_v30, 2  ;;  %v3173_v27 = vld [vmem:[%s4192_s10 + $0x8c] ss:$16 sps:$4 sm:$0xff]   ;;  %v3171_v29 = vld [vmem:[%s4192_s10 + $0x88] ss:$16 sps:$4 sm:$0xff]  }
0x105a   :  { %v1304_v33 = vrot.slane %v1303_v31, 1  ;;  %v1315_v34 = vadd.f32 %v1314_v32, %v1313_v30  ;;  %v3176_v30 = vld [vmem:[%s4192_s10 + $0xa4] ss:$16 sps:$4 sm:$0xff]   ;;  %v3174_v32 = vld [vmem:[%s4192_s10 + $0xa0] ss:$16 sps:$4 sm:$0xff]  }
0x105c   :  { %v1305_v35 = vadd.f32 %v1304_v33, %v1303_v31  ;;  %v1316_v36 = vrot.slane %v1315_v34, 1  ;;  %v3179_v31 = vld [vmem:[%s4192_s10 + $0xac] ss:$16 sps:$4 sm:$0xff]   ;;  %v3177_v33 = vld [vmem:[%s4192_s10 + $0xa8] ss:$16 sps:$4 sm:$0xff]  }
0x105e   :  { %v1306_v37 = vmul.f32 0.0625, %v1305_v35  ;;  %v1317_v38 = vadd.f32 %v1316_v36, %v1315_v34  ;;  %v3182_v34 = vld [vmem:[%s4192_s10 + $0xc4] ss:$16 sps:$4 sm:$0xff]   ;;  %v3185_v35 = vld [vmem:[%s4192_s10 + $0xcc] ss:$16 sps:$4 sm:$0xff]  }
0x105f   :  { %v3180_v36 = vld [vmem:[%s4192_s10 + $0xc0] ss:$16 sps:$4 sm:$0xff]  }
0x1060   :  { %v1318_v39 = vmul.f32 0.0625, %v1317_v38  ;;  %v1319_v40 = vmul.f32 %v1306_v37, %v1306_v37  ;;  %v1323_v41 = vsub.f32 %v1296_v18, %v1306_v37  ;;  %v1322_v42 = vsub.f32 %v1295_v14, %v1306_v37  ;;  %v3152_v14 = vld [vmem:[%s4192_s10 + $0x24] ss:$16 sps:$4 sm:$0xff]   ;;  %v3183_v37 = vld [vmem:[%s4192_s10 + $0xc8] ss:$16 sps:$4 sm:$0xff]  }
0x1061   :  { %v3158_v18 = vld [vmem:[%s4192_s10 + $0x44] ss:$16 sps:$4 sm:$0xff]  }
0x1062   :  { %v1320_v43 = vsub.f32 %v1318_v39, %v1319_v40  ;;  %v3188_v38 = vld [vmem:[%s4192_s10 + $0xe4] ss:$16 sps:$4 sm:$0xff]   ;;  %v3191_v39 = vld [vmem:[%s4192_s10 + $0xec] ss:$16 sps:$4 sm:$0xff]   ;;  %v3186_v40 = vld [vmem:[%s4192_s10 + $0xe0] ss:$16 sps:$4 sm:$0xff]  }
0x1064   :  { %v1321_v44 = vmax.f32 %v1320_v43, 0.0  ;;  %v3197_v43 = vld [vmem:[%s4192_s10 + $0x10c] ss:$16 sps:$4 sm:$0xff]  }
0x1066   :  { %v1324_v45 = vadd.f32 1e-05, %v1321_v44  ;;  %v3192_v44 = vld [vmem:[%s4192_s10 + $0x100] ss:$16 sps:$4 sm:$0xff]  }
0x1068   :  { %3320 = vrsqrt.f32 %v1324_v45  ;;  %v3195_v45 = vld [vmem:[%s4192_s10 + $0x108] ss:$16 sps:$4 sm:$0xff]  }
0x1072   :  { %v3321_v46 = vpop.eup %3320 }
0x1073   :  { %v1327_v48 = vmul.f32 %v3321_v46, %v1323_v41  ;;  %v1326_v49 = vmul.f32 %v3321_v46, %v1322_v42  ;;  %v3189_v41 = vld [vmem:[%s4192_s10 + $0xe8] ss:$16 sps:$4 sm:$0xff]   ;;  %v3194_v42 = vld [vmem:[%s4192_s10 + $0x104] ss:$16 sps:$4 sm:$0xff]  }
0x1074   :  { %v3200_v46 = vld [vmem:[%s4192_s10 + $0x124] ss:$16 sps:$4 sm:$0xff]  }
0x1075   :  { %v1333_v51 = vmul.f32 %v2737_v47, %v1327_v48  ;;  %v1332_v55 = vmul.f32 %v2737_v47, %v1326_v49  ;;  %v3203_v47 = vld [vmem:[%s4192_s10 + $0x12c] ss:$16 sps:$4 sm:$0xff]   ;;  %v3198_v48 = vld [vmem:[%s4192_s10 + $0x120] ss:$16 sps:$4 sm:$0xff]   ;;  %v3201_v49 = vld [vmem:[%s4192_s10 + $0x128] ss:$16 sps:$4 sm:$0xff]  }
0x1077   :  { %v1338_v4 = vadd.f32 %v2738_v50, %v1332_v55  ;;  %v1339_v52 = vadd.f32 %v2738_v50, %v1333_v51  ;;  %v3206_v50 = vld [vmem:[%s4192_s10 + $0x144] ss:$16 sps:$4 sm:$0xff]   ;;  %v3209_v51 = vld [vmem:[%s4192_s10 + $0x14c] ss:$16 sps:$4 sm:$0xff]   ;;  %v3204_v55 = vld [vmem:[%s4192_s10 + $0x140] ss:$16 sps:$4 sm:$0xff]  }
0x1079   :  { %v3802_v54 = vadd.f32 %v1338_v4, %v3756_v53  ;;  %v3805_v61 = vadd.f32 %v1339_v52, %v3759_v56  ;;  %v3140_v53 = vld [vmem:[%s4188_s6 + $0xc0] sm:$0xff]   ;;  %v3141_v56 = vld [vmem:[%s4188_s6 + $0xc8] sm:$0xff]  }
0x107a   :  { %v3207_v4 = vld [vmem:[%s4192_s10 + $0x148] ss:$16 sps:$4 sm:$0xff]   ;;  %v3212_v52 = vld [vmem:[%s4192_s10 + $0x164] ss:$16 sps:$4 sm:$0xff]  }
0x107b   :  { %v1342_v62 = vpack.c.bf16 %v3805_v61, %v3802_v54 }
0x107d   :  { %1344 = vrot.lane.b32.xlu0 %v1342_v62, %s3356_s2  ;;  %3076 = vmatpush3.bf16.msra.mxu1 %v1342_v62 }
0x107e   :  { %3081 = vmatprep.subr.bf16.mxu1 %v3352_v0 }
0x1080   :  { %3078 = vmatmul.mubr.msk.bf16.vlgmr.msra.gmra.mrb[24].mxu1 %vm85_vm1, %v3715_v59  ;;  %v3143_v59 = vld [vmem:[%s4188_s6 + $0xd8] sm:$0xff]  }
0x1081   :  { %3089 = vmatprep.mubr.msk.bf16.mxu1 %vm3353_vm0, %v3352_v0  ;;  %3082 = vmatpush3.bf16.msra.mxu1 %v3140_v53  ;;  %v3210_v53 = vld [vmem:[%s4192_s10 + $0x160] ss:$16 sps:$4 sm:$0xff]  }
0x1082   :  { %3083 = vmatprep.subr.bf16.mxu1 %v3352_v0 }
0x1085   :  { %3084 = vmatpush3.bf16.msra.mxu1 %v3141_v56  ;;  %v3213_v56 = vld [vmem:[%s4192_s10 + $0x168] ss:$16 sps:$4 sm:$0xff]  }
0x1086   :  { %3085 = vmatprep.subr.bf16.mxu1 %v3352_v0 }
0x1089   :  { %3086 = vmatpush3.bf16.msra.mxu1 %v3142_v63  ;;  %v3218_v63 = vld [vmem:[%s4192_s10 + $0x184] ss:$16 sps:$4 sm:$0xff]  }
0x108a   :  { %3087 = vmatprep.subr.bf16.mxu1 %v3352_v0 }
0x108d   :  { %3088 = vmatpush3.bf16.msra.mxu1 %v3143_v59  ;;  %v3221_v59 = vld [vmem:[%s4192_s10 + $0x18c] ss:$16 sps:$4 sm:$0xff]  }
0x108e   :  { %1983 = vmatprep.subr.bf16.mxu1 %v3149_v13 }
0x10ef   :  { %v1345_v1 = vpop.permute.xlu0 %1344 }
0x10f0   :  { %1347 = vst.msk [vmem:[#allocation2 + $0x8] sm:$0xff] %vm613_vm8, %v1345_v1  ;;  %v3216_v1 = vld [vmem:[%s4192_s10 + $0x180] ss:$16 sps:$4 sm:$0xff]  }
0x1153   :  { %v1394_v2 = vpop.f32.mrb[24].mxu1 }
0x1154   :  { %v3079_v3 = vpop.f32.mrb[25].mxu1 }
0x1155   :  { %v1397_v5 = vpop.f32.mrb[26].mxu1  ;;  %v3224_v3 = vld [vmem:[%s4192_s10 + $0x1a4] ss:$16 sps:$4 sm:$0xff]  }
0x1156   :  { %v1401_v6 = vpack.c.bf16 %v1397_v5, %v1394_v2  ;;  %v3080_v7 = vpop.f32.mrb[27].mxu1  ;;  %v3219_v2 = vld [vmem:[%s4192_s10 + $0x188] ss:$16 sps:$4 sm:$0xff]   ;;  %v3227_v5 = vld [vmem:[%s4192_s10 + $0x1ac] ss:$16 sps:$4 sm:$0xff]  }
0x1157   :  { %v3225_v7 = vld [vmem:[%s4192_s10 + $0x1a8] ss:$16 sps:$4 sm:$0xff]  }
0x1158   :  { %1403 = vrot.lane.b32.xlu1 %v1401_v6, %s3355_s25  ;;  %v3222_v6 = vld [vmem:[%s4192_s10 + $0x1a0] ss:$16 sps:$4 sm:$0xff]  }
0x115c   :  { %425 = vrot.lane.b32.xlu1 %v3557_v60, %s3355_s25  ;;  %v3144_v60 = vld [vmem:[%s4192_s10] ss:$16 sps:$4 sm:$0xff]  }
0x1160   :  { %610 = vrot.lane.b32.xlu1 %v3608_v58, %s3356_s2  ;;  %v3146_v58 = vld [vmem:[%s4192_s10 + $0x4] ss:$16 sps:$4 sm:$0xff]  }
0x1161   :  { %1940 = vmatprep.subr.bf16.mxu0 %v3146_v58 }
0x1162   :  { %1941 = vmatpush1.bf16.msra.mxu0 %v3144_v60 }
0x1163   :  { %1942 = vmatprep.subr.bf16.mxu0 %v3152_v14 }
0x1164   :  { %795 = vrot.lane.b32.xlu1 %v3659_v57, %s3357_s23  ;;  %v3147_v57 = vld [vmem:[%s4192_s10 + $0x8] ss:$16 sps:$4 sm:$0xff]  }
0x1166   :  { %1943 = vmatpush1.bf16.msra.mxu0 %v3150_v16 }
0x1167   :  { %1944 = vmatprep.subr.bf16.mxu0 %v3158_v18 }
0x116a   :  { %1945 = vmatpush1.bf16.msra.mxu0 %v3156_v20 }
0x116b   :  { %1946 = vmatprep.subr.bf16.mxu0 %v3164_v22 }
0x116e   :  { %1947 = vmatpush1.bf16.msra.mxu0 %v3162_v24 }
0x116f   :  { %1948 = vmatprep.subr.bf16.mxu0 %v3170_v26 }
0x1172   :  { %1949 = vmatpush1.bf16.msra.mxu0 %v3168_v28 }
0x1173   :  { %1950 = vmatprep.subr.bf16.mxu0 %v3176_v30 }
0x1176   :  { %1951 = vmatpush1.bf16.msra.mxu0 %v3174_v32 }
0x1177   :  { %1952 = vmatprep.subr.bf16.mxu0 %v3182_v34 }
0x117a   :  { %1953 = vmatpush1.bf16.msra.mxu0 %v3180_v36 }
0x117b   :  { %1954 = vmatprep.subr.bf16.mxu0 %v3188_v38 }
0x117e   :  { %1955 = vmatpush1.bf16.msra.mxu0 %v3186_v40 }
0x117f   :  { %1956 = vmatprep.subr.bf16.mxu0 %v3194_v42  ;;  %v3230_v42 = vld [vmem:[%s4192_s10 + $0x1c4] ss:$16 sps:$4 sm:$0xff]  }
0x1182   :  { %1957 = vmatpush1.bf16.msra.mxu0 %v3192_v44  ;;  %v3228_v44 = vld [vmem:[%s4192_s10 + $0x1c0] ss:$16 sps:$4 sm:$0xff]  }
0x1183   :  { %1958 = vmatprep.subr.bf16.mxu0 %v3200_v46  ;;  %v3236_v46 = vld [vmem:[%s4192_s10 + $0x1e4] ss:$16 sps:$4 sm:$0xff]  }
0x1186   :  { %1959 = vmatpush1.bf16.msra.mxu0 %v3198_v48 }
0x1187   :  { %1960 = vmatprep.subr.bf16.mxu0 %v3206_v50  ;;  %v3234_v50 = vld [vmem:[%s4192_s10 + $0x1e0] ss:$16 sps:$4 sm:$0xff]  }
0x118a   :  { %1961 = vmatpush1.bf16.msra.mxu0 %v3204_v55 }
0x118b   :  { %1962 = vmatprep.subr.bf16.mxu0 %v3212_v52  ;;  %v2755_v52 = vld [vmem:[%s4191_s9 + $0x6] ss:$0 sm:$0xff] }
0x118e   :  { %1963 = vmatpush1.bf16.msra.mxu0 %v3210_v53 }
0x118f   :  { %1964 = vmatprep.subr.bf16.mxu0 %v3218_v63 }
0x1192   :  { %1965 = vmatpush1.bf16.msra.mxu0 %v3216_v1 }
0x1193   :  { %1966 = vmatprep.subr.bf16.mxu0 %v3224_v3 }
0x1196   :  { %1967 = vmatpush1.bf16.msra.mxu0 %v3222_v6  ;;  %v3240_v6 = vld [vmem:[#allocation3] ss:$8 sps:$4 sm:$0xff]  }
0x1197   :  { %1968 = vmatprep.subr.bf16.mxu0 %v3230_v42  ;;  %v3296_v42 = vld [vmem:[%s4195_s13 + $0x60] sm:$0xff]  }
0x119a   :  { %1969 = vmatpush1.bf16.msra.mxu0 %v3228_v44  ;;  %v1600_v44 = vlaneseq }
0x119b   :  { %1970 = vmatprep.subr.bf16.mxu0 %v3236_v46 }
0x119e   :  { %1971 = vmatpush1.bf16.msra.mxu0 %v3234_v50 }
0x11ca   :  { %v1404_v8 = vpop.permute.xlu1 %1403 }
0x11cb   :  { %v1407_v9 = vsel %vm194_vm5, %v1342_v62, %v1404_v8  ;;  %v3215_v62 = vld [vmem:[%s4192_s10 + $0x16c] ss:$16 sps:$4 sm:$0xff]   ;;  %v2748_v8 = vld [vmem:[%s4189_s7 + $0x6] ss:$0 sm:$0xff] }
0x11cc   :  { %3090 = vmatmul.mubr.msk.bf16.vlgmr.msra.gmra.mrb[28].mxu1 %vm332_vm6, %v1407_v9 }
0x11cd   :  { %1984 = vmatpush1.bf16.msra.mxu1 %v3147_v57 }
0x11ce   :  { %v426_v10 = vpop.permute.xlu1 %425  ;;  %1985 = vmatprep.subr.bf16.mxu1 %v3155_v15 }
0x11cf   :  { %429 = vst.msk [vmem:[#allocation2] sm:$0xff] %vm428_vm7, %v426_v10 }
0x11d1   :  { %1986 = vmatpush1.bf16.msra.mxu1 %v3153_v17 }
0x11d2   :  { %v611_v11 = vpop.permute.xlu1 %610  ;;  %1987 = vmatprep.subr.bf16.mxu1 %v3161_v19 }
0x11d3   :  { %614 = vst.msk [vmem:[#allocation2] sm:$0xff] %vm613_vm8, %v611_v11 }
0x11d5   :  { %1988 = vmatpush1.bf16.msra.mxu1 %v3159_v21 }
0x11d6   :  { %v796_v12 = vpop.permute.xlu1 %795  ;;  %1989 = vmatprep.subr.bf16.mxu1 %v3167_v23 }
0x11d7   :  { %799 = vst.msk [vmem:[#allocation2] sm:$0xff] %vm798_vm9, %v796_v12 }
0x11d9   :  { %1990 = vmatpush1.bf16.msra.mxu1 %v3165_v25 }
0x11da   :  { %1991 = vmatprep.subr.bf16.mxu1 %v3173_v27 }
0x11dd   :  { %1992 = vmatpush1.bf16.msra.mxu1 %v3171_v29 }
0x11de   :  { %1993 = vmatprep.subr.bf16.mxu1 %v3179_v31 }
0x11e1   :  { %1994 = vmatpush1.bf16.msra.mxu1 %v3177_v33 }
0x11e2   :  { %1995 = vmatprep.subr.bf16.mxu1 %v3185_v35 }
0x11e5   :  { %1996 = vmatpush1.bf16.msra.mxu1 %v3183_v37 }
0x11e6   :  { %1997 = vmatprep.subr.bf16.mxu1 %v3191_v39 }
0x11e9   :  { %1998 = vmatpush1.bf16.msra.mxu1 %v3189_v41 }
0x11ea   :  { %1999 = vmatprep.subr.bf16.mxu1 %v3197_v43  ;;  %v3233_v43 = vld [vmem:[%s4192_s10 + $0x1cc] ss:$16 sps:$4 sm:$0xff]  }
0x11ed   :  { %2000 = vmatpush1.bf16.msra.mxu1 %v3195_v45  ;;  %v3231_v45 = vld [vmem:[%s4192_s10 + $0x1c8] ss:$16 sps:$4 sm:$0xff]  }
0x11ee   :  { %2001 = vmatprep.subr.bf16.mxu1 %v3203_v47  ;;  %v3239_v47 = vld [vmem:[%s4192_s10 + $0x1ec] ss:$16 sps:$4 sm:$0xff]  }
0x11f1   :  { %2002 = vmatpush1.bf16.msra.mxu1 %v3201_v49  ;;  %v2754_v49 = vld [vmem:[%s4190_s8 + $0x6] ss:$0 sm:$0xff] }
0x11f2   :  { %2003 = vmatprep.subr.bf16.mxu1 %v3209_v51  ;;  %v3237_v51 = vld [vmem:[%s4192_s10 + $0x1e8] ss:$16 sps:$4 sm:$0xff]  }
0x11f5   :  { %2004 = vmatpush1.bf16.msra.mxu1 %v3207_v4 }
0x11f6   :  { %2005 = vmatprep.subr.bf16.mxu1 %v3215_v62 }
0x11f9   :  { %2006 = vmatpush1.bf16.msra.mxu1 %v3213_v56 }
0x11fa   :  { %2007 = vmatprep.subr.bf16.mxu1 %v3221_v59 }
0x11fd   :  { %2008 = vmatpush1.bf16.msra.mxu1 %v3219_v2  ;;  %v3242_v2 = vld [vmem:[#allocation3 + $0x4] ss:$8 sps:$4 sm:$0xff]  }
0x11fe   :  { %2009 = vmatprep.subr.bf16.mxu1 %v3227_v5  ;;  %2297 = vmatprep.subr.bf16.mxu0 %v3242_v2 }
0x1201   :  { %2010 = vmatpush1.bf16.msra.mxu1 %v3225_v7 }
0x1202   :  { %2011 = vmatprep.subr.bf16.mxu1 %v3233_v43  ;;  %v3297_v43 = vld [vmem:[%s4195_s13 + $0x20] sm:$0xff]  }
0x1205   :  { %2012 = vmatpush1.bf16.msra.mxu1 %v3231_v45  ;;  %v4080_v45 = vshrl.u32 %v1600_v44, 7 }
0x1206   :  { %2013 = vmatprep.subr.bf16.mxu1 %v3239_v47  ;;  %v4086_v47 = vld [vmem:[%s4193_s11] sm:$0xf] }
0x1207   :  { %v1602_v46 = vsub.s32 0, %v4080_v45 }
0x1209   :  { %2014 = vmatpush1.bf16.msra.mxu1 %v3237_v51  ;;  %v1603_v51 = vrot.slane %v4086_v47, %v1602_v46 }
0x129f   :  { %v1472_v9 = vpop.f32.mrb[28].mxu1 }
0x12a0   :  { %v1473_v10 = vadd.f32 %v2748_v8, %v1472_v9  ;;  %v3091_v11 = vpop.f32.mrb[29].mxu1  ;;  %v1532_v9 = vld [vmem:[#allocation2] sm:$0xff] }
0x12a1   :  { %v1475_v12 = vpop.f32.mrb[30].mxu1  ;;  %v3251_v11 = vld [vmem:[#allocation3 + $0x34] ss:$8 sps:$4 sm:$0xff]  }
0x12a2   :  { %v1479_v60 = vmax.f32 %v1473_v10, 0.0  ;;  %v1476_v58 = vadd.f32 %v2748_v8, %v1475_v12  ;;  %v3092_v57 = vpop.f32.mrb[31].mxu1  ;;  %v3245_v8 = vld [vmem:[#allocation3 + $0x14] ss:$8 sps:$4 sm:$0xff]   ;;  %v3246_v10 = vld [vmem:[#allocation3 + $0x20] ss:$8 sps:$4 sm:$0xff]  }
0x12a3   :  { %v3249_v12 = vld [vmem:[#allocation3 + $0x30] ss:$8 sps:$4 sm:$0xff]   ;;  %v3257_v57 = vld [vmem:[#allocation3 + $0x54] ss:$8 sps:$4 sm:$0xff]  }
0x12a4   :  { %v1491_v13 = vmul.f32 %v1479_v60, %v1479_v60  ;;  %v1480_v14 = vmax.f32 %v1476_v58, 0.0  ;;  %v1481_v15 = vsel %vm194_vm5, %v1479_v60, 0.0  ;;  %v3252_v58 = vld [vmem:[#allocation3 + $0x40] ss:$8 sps:$4 sm:$0xff]  }
0x12a6   :  { %v1482_v16 = vsel %vm194_vm5, %v1480_v14, 0.0  ;;  %v1492_v17 = vmul.f32 %v1480_v14, %v1480_v14  ;;  %v1493_v19 = vsel %vm194_vm5, %v1491_v13, 0.0  ;;  %v3255_v13 = vld [vmem:[#allocation3 + $0x50] ss:$8 sps:$4 sm:$0xff]  }
0x12a7   :  { %v1483_v18 = vadd.f32 %v1482_v16, %v1481_v15  ;;  %v3258_v15 = vld [vmem:[#allocation3 + $0x60] ss:$8 sps:$4 sm:$0xff]   ;;  %v3263_v16 = vld [vmem:[#allocation3 + $0x74] ss:$8 sps:$4 sm:$0xff]  }
0x12a8   :  { %v1494_v20 = vsel %vm194_vm5, %v1492_v17, 0.0  ;;  %v3261_v17 = vld [vmem:[#allocation3 + $0x70] ss:$8 sps:$4 sm:$0xff]  }
0x12a9   :  { %v1484_v21 = vrot.slane %v1483_v18, 4  ;;  %v1495_v22 = vadd.f32 %v1494_v20, %v1493_v19  ;;  %v3264_v19 = vld [vmem:[#allocation3 + $0x80] ss:$8 sps:$4 sm:$0xff]   ;;  %v3269_v20 = vld [vmem:[#allocation3 + $0x94] ss:$8 sps:$4 sm:$0xff]  }
0x12ab   :  { %v1485_v23 = vadd.f32 %v1484_v21, %v1483_v18  ;;  %v1496_v24 = vrot.slane %v1495_v22, 4  ;;  %v3266_v18 = vld [vmem:[#allocation3 + $0x84] ss:$8 sps:$4 sm:$0xff]   ;;  %v3267_v21 = vld [vmem:[#allocation3 + $0x90] ss:$8 sps:$4 sm:$0xff]  }
0x12ad   :  { %v1486_v25 = vrot.slane %v1485_v23, 2  ;;  %v1497_v26 = vadd.f32 %v1496_v24, %v1495_v22  ;;  %v3272_v22 = vld [vmem:[#allocation3 + $0xa4] ss:$8 sps:$4 sm:$0xff]   ;;  %v3275_v24 = vld [vmem:[#allocation3 + $0xb4] ss:$8 sps:$4 sm:$0xff]  }
0x12af   :  { %v1487_v27 = vadd.f32 %v1486_v25, %v1485_v23  ;;  %v1498_v28 = vrot.slane %v1497_v26, 2  ;;  %v3270_v23 = vld [vmem:[#allocation3 + $0xa0] ss:$8 sps:$4 sm:$0xff]   ;;  %v3273_v25 = vld [vmem:[#allocation3 + $0xb0] ss:$8 sps:$4 sm:$0xff]  }
0x12b1   :  { %v1488_v29 = vrot.slane %v1487_v27, 1  ;;  %v1499_v30 = vadd.f32 %v1498_v28, %v1497_v26  ;;  %v3278_v26 = vld [vmem:[#allocation3 + $0xc4] ss:$8 sps:$4 sm:$0xff]   ;;  %v3281_v28 = vld [vmem:[#allocation3 + $0xd4] ss:$8 sps:$4 sm:$0xff]  }
0x12b3   :  { %v1489_v31 = vadd.f32 %v1488_v29, %v1487_v27  ;;  %v1500_v32 = vrot.slane %v1499_v30, 1  ;;  %v3276_v27 = vld [vmem:[#allocation3 + $0xc0] ss:$8 sps:$4 sm:$0xff]   ;;  %v3279_v29 = vld [vmem:[#allocation3 + $0xd0] ss:$8 sps:$4 sm:$0xff]  }
0x12b5   :  { %v1490_v33 = vmul.f32 0.0625, %v1489_v31  ;;  %v1501_v34 = vadd.f32 %v1500_v32, %v1499_v30  ;;  %v3282_v30 = vld [vmem:[#allocation3 + $0xe0] ss:$8 sps:$4 sm:$0xff]   ;;  %v3284_v31 = vld [vmem:[#allocation3 + $0xe4] ss:$8 sps:$4 sm:$0xff]  }
0x12b6   :  { %v3287_v32 = vld [vmem:[#allocation3 + $0xf4] ss:$8 sps:$4 sm:$0xff]  }
0x12b7   :  { %v1502_v35 = vmul.f32 0.0625, %v1501_v34  ;;  %v1503_v36 = vmul.f32 %v1490_v33, %v1490_v33  ;;  %v1507_v37 = vsub.f32 %v1480_v14, %v1490_v33  ;;  %v1506_v38 = vsub.f32 %v1479_v60, %v1490_v33  ;;  %v3254_v60 = vld [vmem:[#allocation3 + $0x44] ss:$8 sps:$4 sm:$0xff]   ;;  %v3285_v33 = vld [vmem:[#allocation3 + $0xf0] ss:$8 sps:$4 sm:$0xff]  }
0x12b8   :  { %v3260_v14 = vld [vmem:[#allocation3 + $0x64] ss:$8 sps:$4 sm:$0xff]   ;;  %v3288_v34 = vld [vmem:[%s4195_s13 + $0x40] sm:$0xff]  }
0x12b9   :  { %v1504_v39 = vsub.f32 %v1502_v35, %v1503_v36  ;;  %v3289_v35 = vld [vmem:[%s4195_s13] sm:$0xff]   ;;  %v3290_v36 = vld [vmem:[%s4195_s13 + $0x48] sm:$0xff]   ;;  %2928 = vmatprep.subr.bf16.mxu1 %v3288_v34 }
0x12bb   :  { %v1505_v40 = vmax.f32 %v1504_v39, 0.0  ;;  %v3293_v39 = vld [vmem:[%s4195_s13 + $0x10] sm:$0xff]  }
0x12bd   :  { %v1508_v41 = vadd.f32 1e-05, %v1505_v40  ;;  %v3294_v40 = vld [vmem:[%s4195_s13 + $0x58] sm:$0xff]  }
0x12bf   :  { %3322 = vrsqrt.f32 %v1508_v41  ;;  %v3295_v41 = vld [vmem:[%s4195_s13 + $0x18] sm:$0xff]  }
0x12c9   :  { %v3323_v48 = vpop.eup %3322 }
0x12ca   :  { %v1511_v55 = vmul.f32 %v3323_v48, %v1507_v37  ;;  %v1510_v4 = vmul.f32 %v3323_v48, %v1506_v38  ;;  %v3291_v37 = vld [vmem:[%s4195_s13 + $0x8] sm:$0xff]   ;;  %v3292_v38 = vld [vmem:[%s4195_s13 + $0x50] sm:$0xff]   ;;  %v1606_v48 = vsub.s32 1, %v4080_v45 }
0x12cc   :  { %v1517_v62 = vmul.f32 %v2754_v49, %v1511_v55  ;;  %v1516_v53 = vmul.f32 %v2754_v49, %v1510_v4  ;;  %v3358_v49 = vmov 1983009808   ;;  %v1607_v55 = vrot.slane %v4086_v47, %v1606_v48 }
0x12cd   :  { %v2033_v50 = vunpack.c.l.s4 %v3358_v49 }
0x12ce   :  { %v1522_v56 = vadd.f32 %v2755_v52, %v1516_v53  ;;  %v1523_v63 = vadd.f32 %v2755_v52, %v1517_v62 }
0x12cf   :  { %v2034_v4 = vunpack.c.0.s8 %v2033_v50 }
0x12d0   :  { %v1524_v59 = vadd.f32 %v1522_v56, %v3802_v54  ;;  %v1525_v1 = vadd.f32 %v1523_v63, %v3805_v61  ;;  %v3243_v54 = vld [vmem:[#allocation3 + $0x10] ss:$8 sps:$4 sm:$0xff]   ;;  %v3248_v61 = vld [vmem:[#allocation3 + $0x24] ss:$8 sps:$4 sm:$0xff]  }
0x12d2   :  { %v1526_v3 = vpack.c.bf16 %v1525_v1, %v1524_v59  ;;  %v2037_v1 = vsub.s32 %v2034_v4, %v4080_v45 }
0x12d4   :  { %1528 = vrot.lane.b32.xlu0 %v1526_v3, %s3357_s23 }
0x1346   :  { %v1529_v5 = vpop.permute.xlu0 %1528 }
0x1347   :  { %1531 = vst.msk [vmem:[#allocation2 + $0x8] sm:$0xff] %vm798_vm9, %v1529_v5 }
0x134e   :  { %v1533_v7 = vld [vmem:[#allocation2 + $0x8] sm:$0xff] }
0x134f   :  { %1972 = vmatprep.mubr.bf16.mxu0 %v1533_v7  ;;  %2015 = vmatprep.mubr.bf16.mxu1 %v1533_v7 }
0x1350   :  { %1973 = vmatmul.mubr.bf16.vlgmr.msra.gmra.mrb[32].mxu0 %v1532_v9  ;;  %2016 = vmatmul.mubr.bf16.vlgmr.msra.gmra.mrb[32].mxu1 %v1532_v9 }
0x1351   :  { %2298 = vmatpush1.bf16.msra.mxu0 %v3240_v6  ;;  %2929 = vmatpush3.bf16.msra.mxu1 %v3289_v35 }
0x1352   :  { %2299 = vmatprep.subr.bf16.mxu0 %v3245_v8  ;;  %2930 = vmatprep.subr.bf16.mxu1 %v3290_v36  ;;  %v3298_v36 = vld [vmem:[%s4195_s13 + $0x68] sm:$0xff]  }
0x1355   :  { %2300 = vmatpush1.bf16.msra.mxu0 %v3243_v54  ;;  %2931 = vmatpush3.bf16.msra.mxu1 %v3291_v37  ;;  %v3299_v37 = vld [vmem:[%s4195_s13 + $0x28] sm:$0xff]  }
0x1356   :  { %2301 = vmatprep.subr.bf16.mxu0 %v3248_v61  ;;  %2932 = vmatprep.subr.bf16.mxu1 %v3292_v38  ;;  %v3300_v38 = vld [vmem:[%s4195_s13 + $0x70] sm:$0xff]  }
0x1359   :  { %2302 = vmatpush1.bf16.msra.mxu0 %v3246_v10  ;;  %2933 = vmatpush3.bf16.msra.mxu1 %v3293_v39  ;;  %v3301_v39 = vld [vmem:[%s4195_s13 + $0x30] sm:$0xff]  }
0x135a   :  { %2303 = vmatprep.subr.bf16.mxu0 %v3251_v11  ;;  %2934 = vmatprep.subr.bf16.mxu1 %v3294_v40  ;;  %v3302_v40 = vld [vmem:[%s4195_s13 + $0x78] sm:$0xff]  }
0x135d   :  { %2304 = vmatpush1.bf16.msra.mxu0 %v3249_v12  ;;  %2935 = vmatpush3.bf16.msra.mxu1 %v3295_v41  ;;  %v3303_v41 = vld [vmem:[%s4195_s13 + $0x38] sm:$0xff]  }
0x135e   :  { %2305 = vmatprep.subr.bf16.mxu0 %v3254_v60  ;;  %2936 = vmatprep.subr.bf16.mxu1 %v3296_v42  ;;  %v1610_v42 = vsub.s32 2, %v4080_v45 }
0x1360   :  { %v1611_v44 = vrot.slane %v4086_v47, %v1610_v42 }
0x1361   :  { %2306 = vmatpush1.bf16.msra.mxu0 %v3252_v58  ;;  %2937 = vmatpush3.bf16.msra.mxu1 %v3297_v43  ;;  %v1614_v43 = vsub.s32 3, %v4080_v45 }
0x1362   :  { %2307 = vmatprep.subr.bf16.mxu0 %v3257_v57  ;;  %2938 = vmatprep.subr.bf16.mxu1 %v3298_v36 }
0x1363   :  { %v1615_v48 = vrot.slane %v4086_v47, %v1614_v43 }
0x1365   :  { %2308 = vmatpush1.bf16.msra.mxu0 %v3255_v13  ;;  %2939 = vmatpush3.bf16.msra.mxu1 %v3299_v37 }
0x1366   :  { %2309 = vmatprep.subr.bf16.mxu0 %v3260_v14  ;;  %2940 = vmatprep.subr.bf16.mxu1 %v3300_v38 }
0x1369   :  { %2310 = vmatpush1.bf16.msra.mxu0 %v3258_v15  ;;  %2941 = vmatpush3.bf16.msra.mxu1 %v3301_v39 }
0x136a   :  { %2311 = vmatprep.subr.bf16.mxu0 %v3263_v16  ;;  %2942 = vmatprep.subr.bf16.mxu1 %v3302_v40 }
0x136d   :  { %2312 = vmatpush1.bf16.msra.mxu0 %v3261_v17  ;;  %2943 = vmatpush3.bf16.msra.mxu1 %v3303_v41 }
0x136e   :  { %2313 = vmatprep.subr.bf16.mxu0 %v3266_v18  ;;  %3093 = vmatprep.subr.bf16.mxu1 %v3352_v0 }
0x1371   :  { %2314 = vmatpush1.bf16.msra.mxu0 %v3264_v19 }
0x1372   :  { %2315 = vmatprep.subr.bf16.mxu0 %v3269_v20 }
0x1375   :  { %2316 = vmatpush1.bf16.msra.mxu0 %v3267_v21 }
0x1376   :  { %2317 = vmatprep.subr.bf16.mxu0 %v3272_v22 }
0x1379   :  { %2318 = vmatpush1.bf16.msra.mxu0 %v3270_v23 }
0x137a   :  { %2319 = vmatprep.subr.bf16.mxu0 %v3275_v24 }
0x137d   :  { %2320 = vmatpush1.bf16.msra.mxu0 %v3273_v25 }
0x137e   :  { %2321 = vmatprep.subr.bf16.mxu0 %v3278_v26 }
0x1381   :  { %2322 = vmatpush1.bf16.msra.mxu0 %v3276_v27 }
0x1382   :  { %2323 = vmatprep.subr.bf16.mxu0 %v3281_v28 }
0x1385   :  { %2324 = vmatpush1.bf16.msra.mxu0 %v3279_v29 }
0x1386   :  { %2325 = vmatprep.subr.bf16.mxu0 %v3284_v31 }
0x1389   :  { %2326 = vmatpush1.bf16.msra.mxu0 %v3282_v30 }
0x138a   :  { %2327 = vmatprep.subr.bf16.mxu0 %v3287_v32 }
0x138d   :  { %2328 = vmatpush1.bf16.msra.mxu0 %v3285_v33 }
0x1423   :  { %v1974_v52 = vpop.f32.mrb[32].mxu0  ;;  %v4091_v62 = vpop.f32.mrb[32].mxu1 }
0x1424   :  { %v1975_v53 = vadd.f32 %v1974_v52, %v1603_v51  ;;  %v1976_v56 = vpop.f32.mrb[33].mxu0  ;;  %v4093_v63 = vpop.f32.mrb[33].mxu1 }
0x1425   :  { %v1977_v59 = vadd.f32 %v1976_v56, %v1607_v55  ;;  %v1978_v2 = vpop.f32.mrb[34].mxu0  ;;  %v4096_v3 = vpop.f32.mrb[34].mxu1 }
0x1426   :  { %v1979_v5 = vadd.f32 %v1978_v2, %v1603_v51  ;;  %v1980_v6 = vpop.f32.mrb[35].mxu0  ;;  %v4098_v7 = vpop.f32.mrb[35].mxu1  ;;  %v2022_v45 = vadd.f32 %v4096_v3, %v1611_v44 }
0x1427   :  { %v2030_v8 = vcombine.low %v1975_v53, %v1977_v59  ;;  %v2031_v9 = vcombine.high %v1975_v53, %v1977_v59  ;;  %v1981_v54 = vadd.f32 %v1980_v6, %v1607_v55  ;;  %v2018_v53 = vadd.f32 %v4091_v62, %v1611_v44 }
0x1428   :  { %v2020_v6 = vadd.f32 %v4093_v63, %v1615_v48  ;;  %v3304_v63 = vld [vmem:[%s4197_s15] sm:$0xff]  }
0x1429   :  { %v2038_v61 = vrot.slane %v2030_v8, %v2037_v1  ;;  %v2045_v10 = vrot.slane %v2031_v9, %v2037_v1  ;;  %v2048_v11 = vcombine.low %v1979_v5, %v1981_v54  ;;  %v2049_v12 = vcombine.high %v1979_v5, %v1981_v54 }
0x142a   :  { %v2024_v8 = vadd.f32 %v4098_v7, %v1615_v48  ;;  %v3305_v7 = vld [vmem:[%s4197_s15 + $0x8] sm:$0xff]  }
0x142b   :  { %v2046_v58 = vcombine.high %v2038_v61, %v2038_v61  ;;  %v2047_v57 = vcombine.high %v2045_v10, %v2045_v10  ;;  %v2056_v13 = vrot.slane %v2048_v11, %v2037_v1  ;;  %v2063_v14 = vrot.slane %v2049_v12, %v2037_v1 }
0x142c   :  { %v2077_v15 = vsel %vm4101_vm12, %v2038_v61, -inf  ;;  %v2079_v16 = vsel %vm4101_vm12, %v2045_v10, -inf }
0x142d   :  { %v2064_v17 = vcombine.high %v2056_v13, %v2056_v13  ;;  %v2065_v18 = vcombine.high %v2063_v14, %v2063_v14  ;;  %v2081_v19 = vsel %vm4101_vm12, %v2056_v13, -inf  ;;  %v2085_v20 = vsel %vm4101_vm12, %v2063_v14, -inf }
0x142e   :  { %v2082_v21 = vmax.f32 %v2077_v15, %v2081_v19  ;;  %v2086_v22 = vmax.f32 %v2079_v16, %v2085_v20  ;;  %v2078_v23 = vsel %vm4101_vm12, %v2046_v58, -inf  ;;  %v2080_v24 = vsel %vm4101_vm12, %v2047_v57, -inf  ;;  %v3306_v15 = vld [vmem:[%s4197_s15 + $0x10] sm:$0xff]   ;;  %v3307_v16 = vld [vmem:[%s4197_s15 + $0x18] sm:$0xff]  }
0x142f   :  { %v2083_v25 = vsel %vm4101_vm12, %v2064_v17, -inf  ;;  %v2087_v26 = vsel %vm4101_vm12, %v2065_v18, -inf  ;;  %v2852_v18 = vld [vmem:[%s4196_s14] ss:$0 sm:$0xff] }
0x1430   :  { %v2084_v27 = vmax.f32 %v2078_v23, %v2083_v25  ;;  %v2088_v28 = vmax.f32 %v2080_v24, %v2087_v26 }
0x1432   :  { %v2089_v29 = vmax.f32 %v2082_v21, %v2084_v27  ;;  %v2090_v30 = vmax.f32 %v2086_v22, %v2088_v28  ;;  %v2869_v28 = vld [vmem:[%s4198_s16] ss:$0 sm:$0xff] }
0x1434   :  { %v2091_v31 = vmax.f32 %v2089_v29, %v2090_v30 }
0x1436   :  { %v2099_v32 = vrot.slane %v2091_v31, %v2037_v1 }
0x1438   :  { %v2100_v33 = vcombine.high %v2099_v32, %v2099_v32  ;;  %v2103_v35 = vpack.c.bf16 %v2099_v32, %v2099_v32 }
0x143a   :  { %v2104_v34 = vpack.c.bf16 %v2100_v33, %v2100_v33 }
0x143c   :  { %2329 = vmatprep.mubr.bf16.mxu0 %v2104_v34 }
0x143d   :  { %2330 = vmatmul.mubr.bf16.vlgmr.msra.gmra.mrb[36].mxu0 %v2103_v35 }
0x1510   :  { %v2331_v46 = vpop.f32.mrb[36].mxu0 }
0x1511   :  { %v2340_v49 = vrot.slane %v2331_v46, 6  ;;  %v2344_v50 = vrot.slane %v2331_v46, 4  ;;  %v2333_v51 = vpop.f32.mrb[37].mxu0  ;;  %v2348_v56 = vrot.slane %v2331_v46, 2 }
0x1512   :  { %v2341_v55 = vrot.slane %v2333_v51, 6  ;;  %v2345_v4 = vrot.slane %v2333_v51, 4  ;;  %v2335_v52 = vpop.f32.mrb[38].mxu0  ;;  %v2349_v5 = vrot.slane %v2333_v51, 2 }
0x1513   :  { %v2352_v59 = vsel %vm2074_vm10, %v2331_v46, %v2340_v49  ;;  %v2336_v1 = vpop.f32.mrb[39].mxu0 }
0x1514   :  { %v2354_v2 = vsel %vm147_vm2, %v2352_v59, %v2344_v50  ;;  %v2353_v47 = vsel %vm2074_vm10, %v2333_v51, %v2341_v55 }
0x1515   :  { %v2355_v9 = vsel %vm147_vm2, %v2353_v47, %v2345_v4  ;;  %v2357_v54 = vsel %vm2356_vm13, %v2354_v2, %v2348_v56 }
0x1516   :  { %v2358_v61 = vsel %vm2356_vm13, %v2355_v9, %v2349_v5  ;;  %v2359_v62 = vadd.f32 %v2357_v54, %v2018_v53  ;;  %v2361_v10 = vadd.f32 %v2357_v54, %v2022_v45 }
0x1517   :  { %v2360_v11 = vadd.f32 %v2358_v61, %v2020_v6  ;;  %v2362_v12 = vadd.f32 %v2358_v61, %v2024_v8 }
0x1518   :  { %v2363_v60 = vmax.f32 %v2359_v62, 0.0  ;;  %v2365_v58 = vmax.f32 %v2361_v10, 0.0 }
0x1519   :  { %v2364_v3 = vmax.f32 %v2360_v11, 0.0  ;;  %v2366_v57 = vmax.f32 %v2362_v12, 0.0 }
0x151a   :  { %v2367_v13 = vpack.c.bf16 %v2365_v58, %v2363_v60 }
0x151b   :  { %v2368_v14 = vpack.c.bf16 %v2366_v57, %v2364_v3 }
0x151d   :  { %2536 = vmatprep.mubr.bf16.mxu1 %v2368_v14 }
0x151e   :  { %2537 = vmatmul.mubr.bf16.vlgmr.msra.gmra.mrb[36].mxu1 %v2367_v13 }
0x151f   :  { %3094 = vmatpush3.bf16.msra.mxu1 %v3304_v63  ;;  %3101 = vmatprep.mubr.msk.bf16.mxu1 %vm3353_vm0, %v3352_v0 }
0x1520   :  { %3095 = vmatprep.subr.bf16.mxu1 %v3352_v0 }
0x1523   :  { %3096 = vmatpush3.bf16.msra.mxu1 %v3305_v7 }
0x1524   :  { %3097 = vmatprep.subr.bf16.mxu1 %v3352_v0 }
0x1527   :  { %3098 = vmatpush3.bf16.msra.mxu1 %v3306_v15 }
0x1528   :  { %3099 = vmatprep.subr.bf16.mxu1 %v3352_v0 }
0x152b   :  { %3100 = vmatpush3.bf16.msra.mxu1 %v3307_v16 }
0x15f1   :  { %v2944_v17 = vpop.f32.mrb[36].mxu1 }
0x15f2   :  { %v2945_v19 = vpop.f32.mrb[37].mxu1 }
0x15f3   :  { %v2946_v20 = vadd.f32 %v2945_v19, %v2944_v17  ;;  %v2947_v21 = vpop.f32.mrb[38].mxu1 }
0x15f4   :  { %v2948_v22 = vpop.f32.mrb[39].mxu1 }
0x15f5   :  { %v2539_v23 = vadd.f32 %v2946_v20, %v2852_v18  ;;  %v2949_v24 = vadd.f32 %v2948_v22, %v2947_v21 }
0x15f7   :  { %v2542_v25 = vadd.f32 %v2949_v24, %v2852_v18  ;;  %v2545_v26 = vmax.f32 %v2539_v23, 0.0 }
0x15f9   :  { %v2546_v27 = vmax.f32 %v2542_v25, 0.0 }
0x15fb   :  { %v2547_v0 = vpack.c.bf16 %v2546_v27, %v2545_v26 }
0x15fd   :  { %3102 = vmatmul.mubr.msk.bf16.vlgmr.msra.gmra.mrb[40].mxu1 %vm332_vm6, %v2547_v0 }
0x16d0   :  { %v2624_v29 = vpop.f32.mrb[40].mxu1 }
0x16d1   :  { %v2625_v30 = vadd.f32 %v2869_v28, %v2624_v29  ;;  %v3103_v31 = vpop.f32.mrb[41].mxu1 }
0x16d2   :  { %v2627_v32 = vpop.f32.mrb[42].mxu1 }
0x16d3   :  { %2632 = vst.msk [vmem:[%s4199_s17] sm:$0xff] %vm2631_vm14, %v2625_v30  ;;  %v2628_v33 = vadd.f32 %v2869_v28, %v2627_v32  ;;  %v3104_v34 = vpop.f32.mrb[43].mxu1 }
0x16d5   :  { %2633 = vst.msk [vmem:[%s4199_s17 + $0x8] sm:$0xff] %vm2631_vm14, %v2628_v33 }
0x16d6   :  { %2638 = vsyncpa [#allocation4], 1 }

</bundles_post_ra>
